<compile_context>
chip_gen: v7x
topology: tpu7x:2x2x1
jax: 0.10.0
libtpu: 0.0.40
codegen_flags: <defaults>
</compile_context>

<pallas_src>
import math

import jax
import jax.numpy as jnp
from jax.experimental import pallas as pl
from jax.experimental.pallas import tpu as pltpu


# ----------------------------------------------------------------------------
# Tiling constants / VMEM budget
# ----------------------------------------------------------------------------
_TILE_V = 1024     # header vocab tile (contiguous, pre-blocked); clamped to V
_TILE_R = 256      # header row tile over B*S rows; clamped to R


def _vmem_limit_bytes() -> int:
    """Generation-aware VMEM budget (v7x: 64 MiB per TC, v5e/v6e: 128 MiB)."""
    try:
        cap = int(pltpu.get_tpu_info().vmem_capacity_bytes)
    except Exception:
        cap = 64 * 1024 * 1024        # conservative fallback (v7x per-TC size)
    if cap <= 64 * 1024 * 1024:
        return 36 * 1024 * 1024       # v7x: leave headroom under 64 MiB
    return 96 * 1024 * 1024           # v5e / v6e: 128 MiB physical


_VMEM_LIMIT = _vmem_limit_bytes()

# Row indices inside the packed per-layer vector block (padded to 8 rows for
# clean (8, 128) sublane tiling).
_VEC_BO, _VEC_B2, _VEC_G1, _VEC_BE1, _VEC_G2, _VEC_BE2 = range(6)
_VEC_ROWS = 8


# ----------------------------------------------------------------------------
# Pallas kernels
# ----------------------------------------------------------------------------
def encoder_stack_kernel(x_ref, wqkv_ref, wo_ref, w1_ref, w2_ref,
                         bqkv_ref, b1_ref, vec_ref, o_ref, act_sc):
    """One encoder layer per grid step; grid = (n_layers,).

    The full (B, S, D) activation lives in the VMEM scratch across the layer
    axis; per-layer weights are streamed once and pipelined against compute.
    """
    l = pl.program_id(0)
    n_layers = pl.num_programs(0)

    # Layer 0: load the (bf16) input activation into the resident VMEM scratch.
    @pl.when(l == 0)
    def _():
        act_sc[...] = x_ref[...]

    x_bf = act_sc[...]                                   # (B, S, D) bf16
    B, S, D = x_bf.shape
    R = B * S
    xr = x_bf.reshape(R, D)                              # all rows -> big MXU M
    x32 = xr.astype(jnp.float32)
    inv_sqrt_d = 1.0 / math.sqrt(D)

    # Packed small per-layer vectors: rows = [bo, b2, g1, be1, g2, be2, pad, pad]
    vec = vec_ref[0]                                     # (8, D) f32
    bo = vec[_VEC_BO:_VEC_BO + 1, :]
    b2 = vec[_VEC_B2:_VEC_B2 + 1, :]
    g1 = vec[_VEC_G1:_VEC_G1 + 1, :]
    be1 = vec[_VEC_BE1:_VEC_BE1 + 1, :]
    g2 = vec[_VEC_G2:_VEC_G2 + 1, :]
    be2 = vec[_VEC_BE2:_VEC_BE2 + 1, :]

    # --- fused QKV projection: (R, D) x (D, 3D), bf16 MXU / f32 accumulate ---
    qkv = jnp.dot(xr, wqkv_ref[0], preferred_element_type=jnp.float32)
    qkv = qkv + bqkv_ref[0]                              # (R, 3D) f32
    q = (qkv[:, :D] * inv_sqrt_d).astype(jnp.bfloat16).reshape(B, S, D)
    k = qkv[:, D:2 * D].astype(jnp.bfloat16).reshape(B, S, D)
    v = qkv[:, 2 * D:3 * D].astype(jnp.bfloat16).reshape(B, S, D)

    # --- single-head self attention (batched, no explicit transpose) ---
    scores = jnp.einsum('bqd,bkd->bqk', q, k,
                        preferred_element_type=jnp.float32)        # (B, S, S)
    scores = scores - jnp.max(scores, axis=-1, keepdims=True)
    e = jnp.exp(scores)
    p = e * pl.reciprocal(jnp.sum(e, axis=-1, keepdims=True), approx=True)
    attn = jnp.einsum('bqk,bkd->bqd', p.astype(jnp.bfloat16), v,
                      preferred_element_type=jnp.float32)          # (B, S, D)
    attn = jnp.dot(attn.reshape(R, D).astype(jnp.bfloat16), wo_ref[0],
                   preferred_element_type=jnp.float32) + bo        # (R, D)

    # --- residual + LayerNorm 1 (f32) ---
    h = x32 + attn
    mu = jnp.mean(h, axis=-1, keepdims=True)
    var = jnp.mean((h - mu) * (h - mu), axis=-1, keepdims=True)
    h = (h - mu) * jax.lax.rsqrt(var + 1e-5) * g1 + be1

    # --- feed-forward (ReLU), bf16 MXU / f32 accumulate ---
    f = jnp.dot(h.astype(jnp.bfloat16), w1_ref[0],
                preferred_element_type=jnp.float32) + b1_ref[0]
    f = jnp.maximum(f, 0.0)
    f = jnp.dot(f.astype(jnp.bfloat16), w2_ref[0],
                preferred_element_type=jnp.float32) + b2

    # --- residual + LayerNorm 2 (f32) ---
    y = h + f
    mu2 = jnp.mean(y, axis=-1, keepdims=True)
    var2 = jnp.mean((y - mu2) * (y - mu2), axis=-1, keepdims=True)
    y = (y - mu2) * jax.lax.rsqrt(var2 + 1e-5) * g2 + be2

    y_bf = y.astype(jnp.bfloat16).reshape(B, S, D)
    act_sc[...] = y_bf                                   # carry to next layer

    # Single HBM writeback, only after the last layer (output block index is
    # constant across the grid, so it is written back once at the end).
    @pl.when(l == n_layers - 1)
    def _():
        o_ref[...] = y_bf


def mlm_logits_kernel(x_ref, w_ref, b_ref, logits_ref, m_ref, s_ref):
    """Vocab-tiled Linear(D -> V) + online softmax statistics.

    grid = (row_tiles, vocab_tiles); m/s output blocks are resident across the
    vocab axis and hold the running row-max / row-sum-of-exp. Logits are stored
    in bf16 (and the statistics are computed from the bf16-rounded values so
    the second pass normalizes them exactly).
    """
    vt = pl.program_id(1)

    @pl.when(vt == 0)
    def _():
        m_ref[...] = jnp.full_like(m_ref, -jnp.inf)
        s_ref[...] = jnp.zeros_like(s_ref)

    logits = jnp.dot(x_ref[...], w_ref[0],
                     preferred_element_type=jnp.float32) + b_ref[...]   # (TR, TV)
    logits_bf = logits.astype(jnp.bfloat16)
    logits_ref[...] = logits_bf                      # bf16 writeback (half bytes)

    lf = logits_bf.astype(jnp.float32)
    m_prev = m_ref[...]
    m_new = jnp.maximum(m_prev, jnp.max(lf, axis=-1, keepdims=True))
    s_ref[...] = (s_ref[...] * jnp.exp(m_prev - m_new)
                  + jnp.sum(jnp.exp(lf - m_new), axis=-1, keepdims=True))
    m_ref[...] = m_new


def softmax_normalize_kernel(logits_ref, m_ref, s_ref, o_ref):
    """Second pass: probs = exp(logits - m) / s (exact divide; memory-bound)."""
    lf = logits_ref[...].astype(jnp.float32)
    o_ref[...] = (jnp.exp(lf - m_ref[...]) / s_ref[...]).astype(o_ref.dtype)


# ----------------------------------------------------------------------------
# Wrappers (pallas_call plumbing)
# ----------------------------------------------------------------------------
def encoder_stack(x_bf16, layers):
    """x_bf16: (B, S, D) bf16 -> (B, S, D) bf16, all layers in one pallas_call."""
    B, S, D = x_bf16.shape
    n_layers = layers["wqkv"].shape[0]

    def layer_spec(arr):
        return pl.BlockSpec((1,) + arr.shape[1:], lambda l: (l, 0, 0))

    # TODO(synk): on v7x (2 TensorCores) a second, 'parallel' grid axis over
    #             batch blocks (layer-outer, activations indexed into a larger
    #             scratch) would engage both cores; kept single-axis here.
    return pl.pallas_call(
        encoder_stack_kernel,
        out_shape=jax.ShapeDtypeStruct((B, S, D), jnp.bfloat16),
        grid=(n_layers,),
        in_specs=[pl.BlockSpec((B, S, D), lambda l: (0, 0, 0)),
                  layer_spec(layers["wqkv"]),
                  layer_spec(layers["wo"]),
                  layer_spec(layers["w1"]),
                  layer_spec(layers["w2"]),
                  layer_spec(layers["bqkv"]),
                  layer_spec(layers["b1"]),
                  layer_spec(layers["vec"])],
        out_specs=pl.BlockSpec((B, S, D), lambda l: (0, 0, 0)),
        scratch_shapes=[pltpu.VMEM((B, S, D), jnp.bfloat16)],
        compiler_params=pltpu.CompilerParams(
            dimension_semantics=("arbitrary",),
            vmem_limit_bytes=_VMEM_LIMIT),
    )(x_bf16, layers["wqkv"], layers["wo"], layers["w1"], layers["w2"],
      layers["bqkv"], layers["b1"], layers["vec"])


def mlm_header(x_bf16, head_w_blocked, head_b, *, tile_r=_TILE_R):
    """x: (B, S, D) bf16 -> softmax probabilities (B, S, V) f32, vocab-tiled.

    head_w_blocked: (nv, D, tv) bf16 — pre-blocked contiguous vocab tiles.
    """
    B, S, D = x_bf16.shape
    nv, _, tv = head_w_blocked.shape
    V = nv * tv
    R = B * S
    xr = x_bf16.reshape(R, D)

    tr = R if R <= tile_r else tile_r
    assert R % tr == 0, "row count must divide the row tile"
    nr = R // tr

    logits, m, s = pl.pallas_call(
        mlm_logits_kernel,
        out_shape=(jax.ShapeDtypeStruct((R, V), jnp.bfloat16),
                   jax.ShapeDtypeStruct((R, 1), jnp.float32),
                   jax.ShapeDtypeStruct((R, 1), jnp.float32)),
        grid=(nr, nv),
        in_specs=[pl.BlockSpec((tr, D), lambda r, v: (r, 0)),
                  pl.BlockSpec((1, D, tv), lambda r, v: (v, 0, 0)),
                  pl.BlockSpec((1, tv), lambda r, v: (0, v))],
        out_specs=(pl.BlockSpec((tr, tv), lambda r, v: (r, v)),
                   pl.BlockSpec((tr, 1), lambda r, v: (r, 0)),
                   pl.BlockSpec((tr, 1), lambda r, v: (r, 0))),
        compiler_params=pltpu.CompilerParams(
            dimension_semantics=("parallel", "arbitrary"),
            vmem_limit_bytes=_VMEM_LIMIT),
    )(xr, head_w_blocked, head_b)

    probs = pl.pallas_call(
        softmax_normalize_kernel,
        out_shape=jax.ShapeDtypeStruct((R, V), jnp.float32),
        grid=(nr, nv),
        in_specs=[pl.BlockSpec((tr, tv), lambda r, v: (r, v)),
                  pl.BlockSpec((tr, 1), lambda r, v: (r, 0)),
                  pl.BlockSpec((tr, 1), lambda r, v: (r, 0))],
        out_specs=pl.BlockSpec((tr, tv), lambda r, v: (r, v)),
        compiler_params=pltpu.CompilerParams(
            dimension_semantics=("parallel", "parallel"),
            vmem_limit_bytes=_VMEM_LIMIT),
    )(logits, m, s)

    return probs.reshape(B, S, V)


# ----------------------------------------------------------------------------
# Parameter construction + full forward
# ----------------------------------------------------------------------------
def sinusoidal_positional_embeddings(max_seq_length, embedding_size):
    pos = jnp.arange(max_seq_length, dtype=jnp.float32)[:, None]
    i = jnp.arange(0, embedding_size, 2, dtype=jnp.float32)
    div = jnp.exp(-math.log(10000.0) * i / embedding_size)
    pe = jnp.zeros((max_seq_length, embedding_size), jnp.float32)
    pe = pe.at[:, 0::2].set(jnp.sin(pos * div))
    pe = pe.at[:, 1::2].set(jnp.cos(pos * div))
    return pe


def init_mlm_params(key, vocab, seq_len, d_model, n_layers, ffn_mult=4):
    keys = jax.random.split(key, 2 + n_layers)
    scale = 1.0 / math.sqrt(d_model)
    F = ffn_mult * d_model

    params = {
        "embedding": jax.random.normal(keys[0], (vocab, d_model), jnp.float32),
        "pos": sinusoidal_positional_embeddings(seq_len, d_model),
    }

    # Per-layer weights, stacked on a leading layer axis (fused pallas_call).
    per = {name: [] for name in ["wqkv", "wo", "w1", "w2", "bqkv", "b1", "vec"]}
    for li in range(n_layers):
        lk = jax.random.split(keys[2 + li], 6)
        wq = jax.random.normal(lk[0], (d_model, d_model)) * scale
        wk = jax.random.normal(lk[1], (d_model, d_model)) * scale
        wv = jax.random.normal(lk[2], (d_model, d_model)) * scale
        per["wqkv"].append(jnp.concatenate([wq, wk, wv], axis=1))        # (D, 3D)
        per["wo"].append(jax.random.normal(lk[3], (d_model, d_model)) * scale)
        per["w1"].append(jax.random.normal(lk[4], (d_model, F)) * scale)
        per["w2"].append(jax.random.normal(lk[5], (F, d_model)) * (1.0 / math.sqrt(F)))
        per["bqkv"].append(jnp.zeros((1, 3 * d_model)))
        per["b1"].append(jnp.zeros((1, F)))
        # Packed small vectors: rows = [bo, b2, g1, be1, g2, be2, pad, pad].
        vec = jnp.zeros((_VEC_ROWS, d_model), jnp.float32)
        vec = vec.at[_VEC_G1].set(1.0).at[_VEC_G2].set(1.0)
        per["vec"].append(vec)

    matmul_weights = {"wqkv", "wo", "w1", "w2"}   # bf16 MXU operands
    layers = {}
    for name, lst in per.items():
        stacked = jnp.stack(lst, axis=0)
        dtype = jnp.bfloat16 if name in matmul_weights else jnp.float32
        layers[name] = stacked.astype(dtype)
    params["layers"] = layers

    # MLM header weight, pre-blocked over the vocab axis into contiguous
    # (nv, D, tv) tiles so each header grid step does ONE large contiguous DMA.
    head_w = (jax.random.normal(keys[1], (d_model, vocab)) * scale
              ).astype(jnp.bfloat16)
    tv = vocab if vocab <= _TILE_V else _TILE_V
    assert vocab % tv == 0, "vocab must divide the vocab tile"
    nv = vocab // tv
    params["head_w"] = head_w.reshape(d_model, nv, tv).transpose(1, 0, 2)  # (nv, D, tv)
    params["head_b"] = jnp.zeros((1, vocab), jnp.float32)
    return params


@jax.jit
def mlm_forward(params, token_ids):
    # Embedding lookup + positional embeddings (glue, not a hot path).
    emb = jnp.take(params["embedding"], token_ids, axis=0)           # (B, S, D)
    x = (emb + params["pos"][None, :, :]).astype(jnp.bfloat16)
    x = encoder_stack(x, params["layers"])                           # (B, S, D) bf16
    return mlm_header(x, params["head_w"], params["head_b"])         # (B, S, V) f32


# ----------------------------------------------------------------------------
if __name__ == "__main__":
    # Lane-aligned toy sizes (D, V multiples of 128 so blocks are MXU/vreg friendly).
    BATCH = 2
    SEQ = 16
    EMBED = 128
    VOCAB = 512
    N_LAYERS = 2

    key = jax.random.PRNGKey(0)
    pkey, dkey = jax.random.split(key)
    params = init_mlm_params(pkey, VOCAB, SEQ, EMBED, N_LAYERS)
    token_ids = jax.random.randint(dkey, (BATCH, SEQ), 0, VOCAB, dtype=jnp.int32)

    probs = mlm_forward(params, token_ids)
    probs = jax.block_until_ready(probs)

    assert probs.shape == (BATCH, SEQ, VOCAB)
    # Exact normalization in the second header pass -> rows sum to 1 tightly.
    assert jnp.allclose(jnp.sum(probs, axis=-1), 1.0, atol=1e-3)
    assert bool(jnp.all(jnp.isfinite(probs)))
    print("KERNEL_OK")
</pallas_src>

<mosaic_0001>
module attributes {stable_mosaic.version = 11 : i64} {
  func.func @softmax_normalize_kernel(%arg0: i32, %arg1: i32, %arg2: memref<32x512xbf16, #tpu.memory_space<vmem>>, %arg3: memref<32x1xf32, #tpu.memory_space<vmem>>, %arg4: memref<32x1xf32, #tpu.memory_space<vmem>>, %arg5: memref<32x512xf32, #tpu.memory_space<vmem>>) attributes {dimension_semantics = [#tpu.dimension_semantics<parallel>, #tpu.dimension_semantics<parallel>], iteration_bounds = array<i64: 1, 1>, scalar_prefetch = 0 : i64, scratch_operands = 0 : i64, tpu.core_type = #tpu.core_type<tc>, window_params = [{transform_indices = @transform_0, window_bounds = array<i64: 32, 512>}, {transform_indices = @transform_1, window_bounds = array<i64: 32, 1>}, {transform_indices = @transform_2, window_bounds = array<i64: 32, 1>}, {transform_indices = @transform_3, window_bounds = array<i64: 32, 512>}]} {
    %c0 = arith.constant 0 : index
    %c0_0 = arith.constant 0 : index
    %0 = vector.load %arg2[%c0, %c0_0] : memref<32x512xbf16, #tpu.memory_space<vmem>>, vector<32x512xbf16>
    %1 = arith.extf %0 : vector<32x512xbf16> to vector<32x512xf32>
    %c0_1 = arith.constant 0 : index
    %c0_2 = arith.constant 0 : index
    %2 = vector.load %arg3[%c0_1, %c0_2] : memref<32x1xf32, #tpu.memory_space<vmem>>, vector<32x1xf32>
    %3 = vector.broadcast %2 : vector<32x1xf32> to vector<32x512xf32>
    %4 = arith.subf %1, %3 : vector<32x512xf32>
    %5 = math.exp %4 : vector<32x512xf32>
    %c0_3 = arith.constant 0 : index
    %c0_4 = arith.constant 0 : index
    %6 = vector.load %arg4[%c0_3, %c0_4] : memref<32x1xf32, #tpu.memory_space<vmem>>, vector<32x1xf32>
    %7 = vector.broadcast %6 : vector<32x1xf32> to vector<32x512xf32>
    %8 = arith.divf %5, %7 : vector<32x512xf32>
    %c0_5 = arith.constant 0 : index
    %c0_6 = arith.constant 0 : index
    %9 = vector.load %arg5[%c0_5, %c0_6] : memref<32x512xf32, #tpu.memory_space<vmem>>, vector<32x512xf32>
    tpu.vector_store %arg5[%c0_5, %c0_6], %8 {strides = array<i32>} : memref<32x512xf32, #tpu.memory_space<vmem>>, vector<32x512xf32>,
    return
  }
  func.func @transform_0(%arg0: i32, %arg1: i32) -> (i32, i32) {
    %c0_i32 = arith.constant 0 : i32
    return %arg0, %arg1 : i32, i32
  }
  func.func @transform_1(%arg0: i32, %arg1: i32) -> (i32, i32) {
    %c0_i32 = arith.constant 0 : i32
    %c0_i32_0 = arith.constant 0 : i32
    return %arg0, %c0_i32 : i32, i32
  }
  func.func @transform_2(%arg0: i32, %arg1: i32) -> (i32, i32) {
    %c0_i32 = arith.constant 0 : i32
    %c0_i32_0 = arith.constant 0 : i32
    return %arg0, %c0_i32 : i32, i32
  }
  func.func @transform_3(%arg0: i32, %arg1: i32) -> (i32, i32) {
    %c0_i32 = arith.constant 0 : i32
    return %arg0, %arg1 : i32, i32
  }
}

module attributes {stable_mosaic.version = 11 : i64} {
  func.func @encoder_stack_kernel(%arg0: i32, %arg1: memref<2x16x128xbf16, #tpu.memory_space<vmem>>, %arg2: memref<1x128x384xbf16, #tpu.memory_space<vmem>>, %arg3: memref<1x128x128xbf16, #tpu.memory_space<vmem>>, %arg4: memref<1x128x512xbf16, #tpu.memory_space<vmem>>, %arg5: memref<1x512x128xbf16, #tpu.memory_space<vmem>>, %arg6: memref<1x1x384xf32, #tpu.memory_space<vmem>>, %arg7: memref<1x1x512xf32, #tpu.memory_space<vmem>>, %arg8: memref<1x8x128xf32, #tpu.memory_space<vmem>>, %arg9: memref<2x16x128xbf16, #tpu.memory_space<vmem>>, %arg10: memref<2x16x128xbf16, #tpu.memory_space<vmem>>) attributes {dimension_semantics = [#tpu.dimension_semantics<arbitrary>], iteration_bounds = array<i64: 2>, scalar_prefetch = 0 : i64, scratch_operands = 1 : i64, tpu.core_type = #tpu.core_type<tc>, window_params = [{pipeline_mode = #tpu.pipeline_mode<synchronous>, transform_indices = @transform_0, window_bounds = array<i64: 2, 16, 128>}, {transform_indices = @transform_1, window_bounds = array<i64: 1, 128, 384>}, {transform_indices = @transform_2, window_bounds = array<i64: 1, 128, 128>}, {transform_indices = @transform_3, window_bounds = array<i64: 1, 128, 512>}, {transform_indices = @transform_4, window_bounds = array<i64: 1, 512, 128>}, {transform_indices = @transform_5, window_bounds = array<i64: 1, 1, 384>}, {transform_indices = @transform_6, window_bounds = array<i64: 1, 1, 512>}, {transform_indices = @transform_7, window_bounds = array<i64: 1, 8, 128>}, {pipeline_mode = #tpu.pipeline_mode<synchronous>, transform_indices = @transform_8, window_bounds = array<i64: 2, 16, 128>}]} {
    %c0_i32 = arith.constant 0 : i32
    %0 = arith.cmpi eq, %arg0, %c0_i32 : i32
    %1 = arith.extui %0 : i1 to i32
    %c0_i32_0 = arith.constant 0 : i32
    %2 = arith.cmpi ne, %1, %c0_i32_0 : i32
    scf.if %2 {
      %c0_47 = arith.constant 0 : index
      %c0_48 = arith.constant 0 : index
      %c0_49 = arith.constant 0 : index
      %124 = vector.load %arg1[%c0_47, %c0_48, %c0_49] : memref<2x16x128xbf16, #tpu.memory_space<vmem>>, vector<2x16x128xbf16>
      %c0_50 = arith.constant 0 : index
      %c0_51 = arith.constant 0 : index
      %c0_52 = arith.constant 0 : index
      %125 = vector.load %arg10[%c0_50, %c0_51, %c0_52] : memref<2x16x128xbf16, #tpu.memory_space<vmem>>, vector<2x16x128xbf16>
      tpu.vector_store %arg10[%c0_50, %c0_51, %c0_52], %124 {strides = array<i32>} : memref<2x16x128xbf16, #tpu.memory_space<vmem>>, vector<2x16x128xbf16>,
    } else {
    }
    %c0 = arith.constant 0 : index
    %c0_1 = arith.constant 0 : index
    %c0_2 = arith.constant 0 : index
    %3 = vector.load %arg10[%c0, %c0_1, %c0_2] : memref<2x16x128xbf16, #tpu.memory_space<vmem>>, vector<2x16x128xbf16>
    %4 = vector.shape_cast %3 : vector<2x16x128xbf16> to vector<32x128xbf16>
    %5 = arith.extf %4 : vector<32x128xbf16> to vector<32x128xf32>
    %c0_3 = arith.constant 0 : index
    %c0_4 = arith.constant 0 : index
    %c0_5 = arith.constant 0 : index
    %6 = vector.load %arg8[%c0_3, %c0_4, %c0_5] : memref<1x8x128xf32, #tpu.memory_space<vmem>>, vector<1x8x128xf32>
    %7 = vector.shape_cast %6 : vector<1x8x128xf32> to vector<8x128xf32>
    %8 = vector.extract_strided_slice %7 {offsets = [0, 0], sizes = [1, 128], strides = [1, 1]} : vector<8x128xf32> to vector<1x128xf32>
    %9 = vector.extract_strided_slice %7 {offsets = [1, 0], sizes = [1, 128], strides = [1, 1]} : vector<8x128xf32> to vector<1x128xf32>
    %10 = vector.extract_strided_slice %7 {offsets = [2, 0], sizes = [1, 128], strides = [1, 1]} : vector<8x128xf32> to vector<1x128xf32>
    %11 = vector.extract_strided_slice %7 {offsets = [3, 0], sizes = [1, 128], strides = [1, 1]} : vector<8x128xf32> to vector<1x128xf32>
    %12 = vector.extract_strided_slice %7 {offsets = [4, 0], sizes = [1, 128], strides = [1, 1]} : vector<8x128xf32> to vector<1x128xf32>
    %13 = vector.extract_strided_slice %7 {offsets = [5, 0], sizes = [1, 128], strides = [1, 1]} : vector<8x128xf32> to vector<1x128xf32>
    %c0_6 = arith.constant 0 : index
    %c0_7 = arith.constant 0 : index
    %c0_8 = arith.constant 0 : index
    %14 = vector.load %arg2[%c0_6, %c0_7, %c0_8] : memref<1x128x384xbf16, #tpu.memory_space<vmem>>, vector<1x128x384xbf16>
    %15 = vector.shape_cast %14 : vector<1x128x384xbf16> to vector<128x384xbf16>
    %cst = arith.constant dense<0.000000e+00> : vector<32x384xf32>
    %16 = tpu.matmul %4, %15, %cst {dimension_numbers = #tpu.dot_dimension_numbers<[1], [0], [0], [1], [0, 0, 1, 1], [], []>} : vector<32x128xbf16>, vector<128x384xbf16>, vector<32x384xf32> -> vector<32x384xf32>
    %c0_9 = arith.constant 0 : index
    %c0_10 = arith.constant 0 : index
    %c0_11 = arith.constant 0 : index
    %17 = vector.load %arg6[%c0_9, %c0_10, %c0_11] : memref<1x1x384xf32, #tpu.memory_space<vmem>>, vector<1x1x384xf32>
    %18 = vector.shape_cast %17 : vector<1x1x384xf32> to vector<1x384xf32>
    %19 = vector.broadcast %18 : vector<1x384xf32> to vector<32x384xf32>
    %20 = arith.addf %16, %19 : vector<32x384xf32>
    %21 = vector.extract_strided_slice %20 {offsets = [0, 0], sizes = [32, 128], strides = [1, 1]} : vector<32x384xf32> to vector<32x128xf32>
    %cst_12 = arith.constant 0.0883883461 : f32
    %22 = vector.broadcast %cst_12 : f32 to vector<32x128xf32>
    %23 = arith.mulf %21, %22 : vector<32x128xf32>
    %24 = arith.truncf %23 : vector<32x128xf32> to vector<32x128xbf16>
    %25 = vector.shape_cast %24 : vector<32x128xbf16> to vector<2x16x128xbf16>
    %26 = vector.extract_strided_slice %20 {offsets = [0, 128], sizes = [32, 128], strides = [1, 1]} : vector<32x384xf32> to vector<32x128xf32>
    %27 = arith.truncf %26 : vector<32x128xf32> to vector<32x128xbf16>
    %28 = vector.shape_cast %27 : vector<32x128xbf16> to vector<2x16x128xbf16>
    %29 = vector.extract_strided_slice %20 {offsets = [0, 256], sizes = [32, 128], strides = [1, 1]} : vector<32x384xf32> to vector<32x128xf32>
    %30 = arith.truncf %29 : vector<32x128xf32> to vector<32x128xbf16>
    %31 = vector.shape_cast %30 : vector<32x128xbf16> to vector<2x16x128xbf16>
    "tpu.trace_start"() <{level = 10 : i32, message = "bqd,bkd->bqk"}> : () -> ()
    %cst_13 = arith.constant dense<0.000000e+00> : vector<2x16x16xf32>
    %32 = tpu.matmul %25, %28, %cst_13 {dimension_numbers = #tpu.dot_dimension_numbers<[2], [2], [1], [1], [0, 0, 0, 1, 1, 1], [0], [0]>} : vector<2x16x128xbf16>, vector<2x16x128xbf16>, vector<2x16x16xf32> -> vector<2x16x16xf32>
    "tpu.trace_stop"() : () -> ()
    %cst_14 = arith.constant dense<0xFF800000> : vector<2x16xf32>
    %33 = vector.multi_reduction <maximumf>, %32, %cst_14 [2] : vector<2x16x16xf32> to vector<2x16xf32>
    %34 = vector.shape_cast %33 : vector<2x16xf32> to vector<2x16x1xf32>
    %35 = vector.broadcast %34 : vector<2x16x1xf32> to vector<2x16x16xf32>
    %36 = arith.subf %32, %35 : vector<2x16x16xf32>
    %37 = math.exp %36 : vector<2x16x16xf32>
    %cst_15 = arith.constant dense<0.000000e+00> : vector<2x16xf32>
    %38 = vector.multi_reduction <add>, %37, %cst_15 [2] : vector<2x16x16xf32> to vector<2x16xf32>
    %39 = vector.shape_cast %38 : vector<2x16xf32> to vector<2x16x1xf32>
    %40 = tpu.reciprocal %39 {approx = true} : vector<2x16x1xf32> -> vector<2x16x1xf32>
    %41 = vector.broadcast %40 : vector<2x16x1xf32> to vector<2x16x16xf32>
    %42 = arith.mulf %37, %41 : vector<2x16x16xf32>
    %43 = arith.truncf %42 : vector<2x16x16xf32> to vector<2x16x16xbf16>
    "tpu.trace_start"() <{level = 10 : i32, message = "bqk,bkd->bqd"}> : () -> ()
    %cst_16 = arith.constant dense<0.000000e+00> : vector<2x16x128xf32>
    %44 = tpu.matmul %43, %31, %cst_16 {dimension_numbers = #tpu.dot_dimension_numbers<[2], [1], [1], [2], [0, 0, 0, 1, 1, 2], [0], [0]>} : vector<2x16x16xbf16>, vector<2x16x128xbf16>, vector<2x16x128xf32> -> vector<2x16x128xf32>
    "tpu.trace_stop"() : () -> ()
    %45 = vector.shape_cast %44 : vector<2x16x128xf32> to vector<32x128xf32>
    %46 = arith.truncf %45 : vector<32x128xf32> to vector<32x128xbf16>
    %c0_17 = arith.constant 0 : index
    %c0_18 = arith.constant 0 : index
    %c0_19 = arith.constant 0 : index
    %47 = vector.load %arg3[%c0_17, %c0_18, %c0_19] : memref<1x128x128xbf16, #tpu.memory_space<vmem>>, vector<1x128x128xbf16>
    %48 = vector.shape_cast %47 : vector<1x128x128xbf16> to vector<128x128xbf16>
    %cst_20 = arith.constant dense<0.000000e+00> : vector<32x128xf32>
    %49 = tpu.matmul %46, %48, %cst_20 {dimension_numbers = #tpu.dot_dimension_numbers<[1], [0], [0], [1], [0, 0, 1, 1], [], []>} : vector<32x128xbf16>, vector<128x128xbf16>, vector<32x128xf32> -> vector<32x128xf32>
    %50 = vector.broadcast %8 : vector<1x128xf32> to vector<32x128xf32>
    %51 = arith.addf %49, %50 : vector<32x128xf32>
    %52 = arith.addf %5, %51 : vector<32x128xf32>
    %cst_21 = arith.constant dense<0.000000e+00> : vector<32xf32>
    %53 = vector.multi_reduction <add>, %52, %cst_21 [1] : vector<32x128xf32> to vector<32xf32>
    %54 = vector.shape_cast %53 : vector<32xf32> to vector<32x1xf32>
    %cst_22 = arith.constant 1.280000e+02 : f32
    %55 = vector.broadcast %cst_22 : f32 to vector<32x1xf32>
    %56 = arith.divf %54, %55 : vector<32x1xf32>
    %57 = vector.broadcast %56 : vector<32x1xf32> to vector<32x128xf32>
    %58 = arith.subf %52, %57 : vector<32x128xf32>
    %59 = vector.broadcast %56 : vector<32x1xf32> to vector<32x128xf32>
    %60 = arith.subf %52, %59 : vector<32x128xf32>
    %61 = arith.mulf %58, %60 : vector<32x128xf32>
    %cst_23 = arith.constant dense<0.000000e+00> : vector<32xf32>
    %62 = vector.multi_reduction <add>, %61, %cst_23 [1] : vector<32x128xf32> to vector<32xf32>
    %63 = vector.shape_cast %62 : vector<32xf32> to vector<32x1xf32>
    %cst_24 = arith.constant 1.280000e+02 : f32
    %64 = vector.broadcast %cst_24 : f32 to vector<32x1xf32>
    %65 = arith.divf %63, %64 : vector<32x1xf32>
    %66 = vector.broadcast %56 : vector<32x1xf32> to vector<32x128xf32>
    %67 = arith.subf %52, %66 : vector<32x128xf32>
    %cst_25 = arith.constant 9.99999974E-6 : f32
    %68 = vector.broadcast %cst_25 : f32 to vector<32x1xf32>
    %69 = arith.addf %65, %68 : vector<32x1xf32>
    %70 = math.rsqrt %69 : vector<32x1xf32>
    %71 = vector.broadcast %70 : vector<32x1xf32> to vector<32x128xf32>
    %72 = arith.mulf %67, %71 : vector<32x128xf32>
    %73 = vector.broadcast %10 : vector<1x128xf32> to vector<32x128xf32>
    %74 = arith.mulf %72, %73 : vector<32x128xf32>
    %75 = vector.broadcast %11 : vector<1x128xf32> to vector<32x128xf32>
    %76 = arith.addf %74, %75 : vector<32x128xf32>
    %77 = arith.truncf %76 : vector<32x128xf32> to vector<32x128xbf16>
    %c0_26 = arith.constant 0 : index
    %c0_27 = arith.constant 0 : index
    %c0_28 = arith.constant 0 : index
    %78 = vector.load %arg4[%c0_26, %c0_27, %c0_28] : memref<1x128x512xbf16, #tpu.memory_space<vmem>>, vector<1x128x512xbf16>
    %79 = vector.shape_cast %78 : vector<1x128x512xbf16> to vector<128x512xbf16>
    %cst_29 = arith.constant dense<0.000000e+00> : vector<32x512xf32>
    %80 = tpu.matmul %77, %79, %cst_29 {dimension_numbers = #tpu.dot_dimension_numbers<[1], [0], [0], [1], [0, 0, 1, 1], [], []>} : vector<32x128xbf16>, vector<128x512xbf16>, vector<32x512xf32> -> vector<32x512xf32>
    %c0_30 = arith.constant 0 : index
    %c0_31 = arith.constant 0 : index
    %c0_32 = arith.constant 0 : index
    %81 = vector.load %arg7[%c0_30, %c0_31, %c0_32] : memref<1x1x512xf32, #tpu.memory_space<vmem>>, vector<1x1x512xf32>
    %82 = vector.shape_cast %81 : vector<1x1x512xf32> to vector<1x512xf32>
    %83 = vector.broadcast %82 : vector<1x512xf32> to vector<32x512xf32>
    %84 = arith.addf %80, %83 : vector<32x512xf32>
    %cst_33 = arith.constant 0.000000e+00 : f32
    %85 = vector.broadcast %cst_33 : f32 to vector<32x512xf32>
    %86 = arith.maximumf %84, %85 : vector<32x512xf32>
    %87 = arith.truncf %86 : vector<32x512xf32> to vector<32x512xbf16>
    %c0_34 = arith.constant 0 : index
    %c0_35 = arith.constant 0 : index
    %c0_36 = arith.constant 0 : index
    %88 = vector.load %arg5[%c0_34, %c0_35, %c0_36] : memref<1x512x128xbf16, #tpu.memory_space<vmem>>, vector<1x512x128xbf16>
    %89 = vector.shape_cast %88 : vector<1x512x128xbf16> to vector<512x128xbf16>
    %cst_37 = arith.constant dense<0.000000e+00> : vector<32x128xf32>
    %90 = tpu.matmul %87, %89, %cst_37 {dimension_numbers = #tpu.dot_dimension_numbers<[1], [0], [0], [1], [0, 0, 1, 1], [], []>} : vector<32x512xbf16>, vector<512x128xbf16>, vector<32x128xf32> -> vector<32x128xf32>
    %91 = vector.broadcast %9 : vector<1x128xf32> to vector<32x128xf32>
    %92 = arith.addf %90, %91 : vector<32x128xf32>
    %93 = arith.addf %76, %92 : vector<32x128xf32>
    %cst_38 = arith.constant dense<0.000000e+00> : vector<32xf32>
    %94 = vector.multi_reduction <add>, %93, %cst_38 [1] : vector<32x128xf32> to vector<32xf32>
    %95 = vector.shape_cast %94 : vector<32xf32> to vector<32x1xf32>
    %cst_39 = arith.constant 1.280000e+02 : f32
    %96 = vector.broadcast %cst_39 : f32 to vector<32x1xf32>
    %97 = arith.divf %95, %96 : vector<32x1xf32>
    %98 = vector.broadcast %97 : vector<32x1xf32> to vector<32x128xf32>
    %99 = arith.subf %93, %98 : vector<32x128xf32>
    %100 = vector.broadcast %97 : vector<32x1xf32> to vector<32x128xf32>
    %101 = arith.subf %93, %100 : vector<32x128xf32>
    %102 = arith.mulf %99, %101 : vector<32x128xf32>
    %cst_40 = arith.constant dense<0.000000e+00> : vector<32xf32>
    %103 = vector.multi_reduction <add>, %102, %cst_40 [1] : vector<32x128xf32> to vector<32xf32>
    %104 = vector.shape_cast %103 : vector<32xf32> to vector<32x1xf32>
    %cst_41 = arith.constant 1.280000e+02 : f32
    %105 = vector.broadcast %cst_41 : f32 to vector<32x1xf32>
    %106 = arith.divf %104, %105 : vector<32x1xf32>
    %107 = vector.broadcast %97 : vector<32x1xf32> to vector<32x128xf32>
    %108 = arith.subf %93, %107 : vector<32x128xf32>
    %cst_42 = arith.constant 9.99999974E-6 : f32
    %109 = vector.broadcast %cst_42 : f32 to vector<32x1xf32>
    %110 = arith.addf %106, %109 : vector<32x1xf32>
    %111 = math.rsqrt %110 : vector<32x1xf32>
    %112 = vector.broadcast %111 : vector<32x1xf32> to vector<32x128xf32>
    %113 = arith.mulf %108, %112 : vector<32x128xf32>
    %114 = vector.broadcast %12 : vector<1x128xf32> to vector<32x128xf32>
    %115 = arith.mulf %113, %114 : vector<32x128xf32>
    %116 = vector.broadcast %13 : vector<1x128xf32> to vector<32x128xf32>
    %117 = arith.addf %115, %116 : vector<32x128xf32>
    %118 = arith.truncf %117 : vector<32x128xf32> to vector<32x128xbf16>
    %119 = vector.shape_cast %118 : vector<32x128xbf16> to vector<2x16x128xbf16>
    %c0_43 = arith.constant 0 : index
    %c0_44 = arith.constant 0 : index
    %c0_45 = arith.constant 0 : index
    %120 = vector.load %arg10[%c0_43, %c0_44, %c0_45] : memref<2x16x128xbf16, #tpu.memory_space<vmem>>, vector<2x16x128xbf16>
    tpu.vector_store %arg10[%c0_43, %c0_44, %c0_45], %119 {strides = array<i32>} : memref<2x16x128xbf16, #tpu.memory_space<vmem>>, vector<2x16x128xbf16>,
    %c1_i32 = arith.constant 1 : i32
    %121 = arith.cmpi eq, %arg0, %c1_i32 : i32
    %122 = arith.extui %121 : i1 to i32
    %c0_i32_46 = arith.constant 0 : i32
    %123 = arith.cmpi ne, %122, %c0_i32_46 : i32
    scf.if %123 {
      %c0_47 = arith.constant 0 : index
      %c0_48 = arith.constant 0 : index
      %c0_49 = arith.constant 0 : index
      %124 = vector.load %arg9[%c0_47, %c0_48, %c0_49] : memref<2x16x128xbf16, #tpu.memory_space<vmem>>, vector<2x16x128xbf16>
      tpu.vector_store %arg9[%c0_47, %c0_48, %c0_49], %119 {strides = array<i32>} : memref<2x16x128xbf16, #tpu.memory_space<vmem>>, vector<2x16x128xbf16>,
    } else {
    }
    return
  }
  func.func @transform_0(%arg0: i32) -> (i32, i32, i32) {
    %c0_i32 = arith.constant 0 : i32
    %c0_i32_0 = arith.constant 0 : i32
    %c0_i32_1 = arith.constant 0 : i32
    %c0_i32_2 = arith.constant 0 : i32
    return %c0_i32, %c0_i32_0, %c0_i32_1 : i32, i32, i32
  }
  func.func @transform_1(%arg0: i32) -> (i32, i32, i32) {
    %c0_i32 = arith.constant 0 : i32
    %c0_i32_0 = arith.constant 0 : i32
    %c0_i32_1 = arith.constant 0 : i32
    return %arg0, %c0_i32, %c0_i32_0 : i32, i32, i32
  }
  func.func @transform_2(%arg0: i32) -> (i32, i32, i32) {
    %c0_i32 = arith.constant 0 : i32
    %c0_i32_0 = arith.constant 0 : i32
    %c0_i32_1 = arith.constant 0 : i32
    return %arg0, %c0_i32, %c0_i32_0 : i32, i32, i32
  }
  func.func @transform_3(%arg0: i32) -> (i32, i32, i32) {
    %c0_i32 = arith.constant 0 : i32
    %c0_i32_0 = arith.constant 0 : i32
    %c0_i32_1 = arith.constant 0 : i32
    return %arg0, %c0_i32, %c0_i32_0 : i32, i32, i32
  }
  func.func @transform_4(%arg0: i32) -> (i32, i32, i32) {
    %c0_i32 = arith.constant 0 : i32
    %c0_i32_0 = arith.constant 0 : i32
    %c0_i32_1 = arith.constant 0 : i32
    return %arg0, %c0_i32, %c0_i32_0 : i32, i32, i32
  }
  func.func @transform_5(%arg0: i32) -> (i32, i32, i32) {
    %c0_i32 = arith.constant 0 : i32
    %c0_i32_0 = arith.constant 0 : i32
    %c0_i32_1 = arith.constant 0 : i32
    return %arg0, %c0_i32, %c0_i32_0 : i32, i32, i32
  }
  func.func @transform_6(%arg0: i32) -> (i32, i32, i32) {
    %c0_i32 = arith.constant 0 : i32
    %c0_i32_0 = arith.constant 0 : i32
    %c0_i32_1 = arith.constant 0 : i32
    return %arg0, %c0_i32, %c0_i32_0 : i32, i32, i32
  }
  func.func @transform_7(%arg0: i32) -> (i32, i32, i32) {
    %c0_i32 = arith.constant 0 : i32
    %c0_i32_0 = arith.constant 0 : i32
    %c0_i32_1 = arith.constant 0 : i32
    return %arg0, %c0_i32, %c0_i32_0 : i32, i32, i32
  }
  func.func @transform_8(%arg0: i32) -> (i32, i32, i32) {
    %c0_i32 = arith.constant 0 : i32
    %c0_i32_0 = arith.constant 0 : i32
    %c0_i32_1 = arith.constant 0 : i32
    %c0_i32_2 = arith.constant 0 : i32
    return %c0_i32, %c0_i32_0, %c0_i32_1 : i32, i32, i32
  }
}

module attributes {stable_mosaic.version = 11 : i64} {
  func.func @mlm_logits_kernel(%arg0: i32, %arg1: i32, %arg2: memref<32x128xbf16, #tpu.memory_space<vmem>>, %arg3: memref<1x128x512xbf16, #tpu.memory_space<vmem>>, %arg4: memref<1x512xf32, #tpu.memory_space<vmem>>, %arg5: memref<32x512xbf16, #tpu.memory_space<vmem>>, %arg6: memref<32x1xf32, #tpu.memory_space<vmem>>, %arg7: memref<32x1xf32, #tpu.memory_space<vmem>>) attributes {dimension_semantics = [#tpu.dimension_semantics<parallel>, #tpu.dimension_semantics<arbitrary>], iteration_bounds = array<i64: 1, 1>, scalar_prefetch = 0 : i64, scratch_operands = 0 : i64, tpu.core_type = #tpu.core_type<tc>, window_params = [{transform_indices = @transform_0, window_bounds = array<i64: 32, 128>}, {transform_indices = @transform_1, window_bounds = array<i64: 1, 128, 512>}, {transform_indices = @transform_2, window_bounds = array<i64: 1, 512>}, {transform_indices = @transform_3, window_bounds = array<i64: 32, 512>}, {transform_indices = @transform_4, window_bounds = array<i64: 32, 1>}, {transform_indices = @transform_5, window_bounds = array<i64: 32, 1>}]} {
    %c0_i32 = arith.constant 0 : i32
    %0 = arith.cmpi eq, %arg1, %c0_i32 : i32
    %1 = arith.extui %0 : i1 to i32
    %c0_i32_0 = arith.constant 0 : i32
    %2 = arith.cmpi ne, %1, %c0_i32_0 : i32
    scf.if %2 {
      %cst_19 = arith.constant 0xFF800000 : f32
      %29 = vector.broadcast %cst_19 : f32 to vector<32x1xf32>
      %c0_20 = arith.constant 0 : index
      %c0_21 = arith.constant 0 : index
      %30 = vector.load %arg6[%c0_20, %c0_21] : memref<32x1xf32, #tpu.memory_space<vmem>>, vector<32x1xf32>
      tpu.vector_store %arg6[%c0_20, %c0_21], %29 {strides = array<i32>} : memref<32x1xf32, #tpu.memory_space<vmem>>, vector<32x1xf32>,
      %cst_22 = arith.constant 0.000000e+00 : f32
      %31 = vector.broadcast %cst_22 : f32 to vector<32x1xf32>
      %c0_23 = arith.constant 0 : index
      %c0_24 = arith.constant 0 : index
      %32 = vector.load %arg7[%c0_23, %c0_24] : memref<32x1xf32, #tpu.memory_space<vmem>>, vector<32x1xf32>
      tpu.vector_store %arg7[%c0_23, %c0_24], %31 {strides = array<i32>} : memref<32x1xf32, #tpu.memory_space<vmem>>, vector<32x1xf32>,
    } else {
    }
    %c0 = arith.constant 0 : index
    %c0_1 = arith.constant 0 : index
    %3 = vector.load %arg2[%c0, %c0_1] : memref<32x128xbf16, #tpu.memory_space<vmem>>, vector<32x128xbf16>
    %c0_2 = arith.constant 0 : index
    %c0_3 = arith.constant 0 : index
    %c0_4 = arith.constant 0 : index
    %4 = vector.load %arg3[%c0_2, %c0_3, %c0_4] : memref<1x128x512xbf16, #tpu.memory_space<vmem>>, vector<1x128x512xbf16>
    %5 = vector.shape_cast %4 : vector<1x128x512xbf16> to vector<128x512xbf16>
    %cst = arith.constant dense<0.000000e+00> : vector<32x512xf32>
    %6 = tpu.matmul %3, %5, %cst {dimension_numbers = #tpu.dot_dimension_numbers<[1], [0], [0], [1], [0, 0, 1, 1], [], []>} : vector<32x128xbf16>, vector<128x512xbf16>, vector<32x512xf32> -> vector<32x512xf32>
    %c0_5 = arith.constant 0 : index
    %c0_6 = arith.constant 0 : index
    %7 = vector.load %arg4[%c0_5, %c0_6] : memref<1x512xf32, #tpu.memory_space<vmem>>, vector<1x512xf32>
    %8 = vector.broadcast %7 : vector<1x512xf32> to vector<32x512xf32>
    %9 = arith.addf %6, %8 : vector<32x512xf32>
    %10 = arith.truncf %9 : vector<32x512xf32> to vector<32x512xbf16>
    %c0_7 = arith.constant 0 : index
    %c0_8 = arith.constant 0 : index
    %11 = vector.load %arg5[%c0_7, %c0_8] : memref<32x512xbf16, #tpu.memory_space<vmem>>, vector<32x512xbf16>
    tpu.vector_store %arg5[%c0_7, %c0_8], %10 {strides = array<i32>} : memref<32x512xbf16, #tpu.memory_space<vmem>>, vector<32x512xbf16>,
    %12 = arith.extf %10 : vector<32x512xbf16> to vector<32x512xf32>
    %c0_9 = arith.constant 0 : index
    %c0_10 = arith.constant 0 : index
    %13 = vector.load %arg6[%c0_9, %c0_10] : memref<32x1xf32, #tpu.memory_space<vmem>>, vector<32x1xf32>
    %cst_11 = arith.constant dense<0xFF800000> : vector<32xf32>
    %14 = vector.multi_reduction <maximumf>, %12, %cst_11 [1] : vector<32x512xf32> to vector<32xf32>
    %15 = vector.shape_cast %14 : vector<32xf32> to vector<32x1xf32>
    %16 = arith.maximumf %13, %15 : vector<32x1xf32>
    %c0_12 = arith.constant 0 : index
    %c0_13 = arith.constant 0 : index
    %17 = vector.load %arg7[%c0_12, %c0_13] : memref<32x1xf32, #tpu.memory_space<vmem>>, vector<32x1xf32>
    %18 = arith.subf %13, %16 : vector<32x1xf32>
    %19 = math.exp %18 : vector<32x1xf32>
    %20 = arith.mulf %17, %19 : vector<32x1xf32>
    %21 = vector.broadcast %16 : vector<32x1xf32> to vector<32x512xf32>
    %22 = arith.subf %12, %21 : vector<32x512xf32>
    %23 = math.exp %22 : vector<32x512xf32>
    %cst_14 = arith.constant dense<0.000000e+00> : vector<32xf32>
    %24 = vector.multi_reduction <add>, %23, %cst_14 [1] : vector<32x512xf32> to vector<32xf32>
    %25 = vector.shape_cast %24 : vector<32xf32> to vector<32x1xf32>
    %26 = arith.addf %20, %25 : vector<32x1xf32>
    %c0_15 = arith.constant 0 : index
    %c0_16 = arith.constant 0 : index
    %27 = vector.load %arg7[%c0_15, %c0_16] : memref<32x1xf32, #tpu.memory_space<vmem>>, vector<32x1xf32>
    tpu.vector_store %arg7[%c0_15, %c0_16], %26 {strides = array<i32>} : memref<32x1xf32, #tpu.memory_space<vmem>>, vector<32x1xf32>,
    %c0_17 = arith.constant 0 : index
    %c0_18 = arith.constant 0 : index
    %28 = vector.load %arg6[%c0_17, %c0_18] : memref<32x1xf32, #tpu.memory_space<vmem>>, vector<32x1xf32>
    tpu.vector_store %arg6[%c0_17, %c0_18], %16 {strides = array<i32>} : memref<32x1xf32, #tpu.memory_space<vmem>>, vector<32x1xf32>,
    return
  }
  func.func @transform_0(%arg0: i32, %arg1: i32) -> (i32, i32) {
    %c0_i32 = arith.constant 0 : i32
    %c0_i32_0 = arith.constant 0 : i32
    return %arg0, %c0_i32 : i32, i32
  }
  func.func @transform_1(%arg0: i32, %arg1: i32) -> (i32, i32, i32) {
    %c0_i32 = arith.constant 0 : i32
    %c0_i32_0 = arith.constant 0 : i32
    %c0_i32_1 = arith.constant 0 : i32
    return %arg1, %c0_i32, %c0_i32_0 : i32, i32, i32
  }
  func.func @transform_2(%arg0: i32, %arg1: i32) -> (i32, i32) {
    %c0_i32 = arith.constant 0 : i32
    %c0_i32_0 = arith.constant 0 : i32
    return %c0_i32, %arg1 : i32, i32
  }
  func.func @transform_3(%arg0: i32, %arg1: i32) -> (i32, i32) {
    %c0_i32 = arith.constant 0 : i32
    return %arg0, %arg1 : i32, i32
  }
  func.func @transform_4(%arg0: i32, %arg1: i32) -> (i32, i32) {
    %c0_i32 = arith.constant 0 : i32
    %c0_i32_0 = arith.constant 0 : i32
    return %arg0, %c0_i32 : i32, i32
  }
  func.func @transform_5(%arg0: i32, %arg1: i32) -> (i32, i32) {
    %c0_i32 = arith.constant 0 : i32
    %c0_i32_0 = arith.constant 0 : i32
    return %arg0, %c0_i32 : i32, i32
  }
}

</mosaic_0001>

<bundles_post_ra>
// kernel: mlm_forward.5
= control target key start
LH: loop header
LB: loop body
LE: loop exit
PB: predicated region body
PF: predicated region fallthrough
CT: control target
= control target key end

     0   :  { %v257_v2 = vmov 0   ;;  %s341_s0 = inlined_call_operand.vmem [shape: bf16[32,512], index: 0, kind: input, shape index: {}]   ;;  %s342_s1 = inlined_call_operand.vmem [shape: f32[32,1], index: 1, kind: input, shape index: {}]   ;;  %s343_s2 = inlined_call_operand.vmem [shape: f32[32,1], index: 2, kind: input, shape index: {}]   ;;  %s344_s3 = inlined_call_operand.hbm [shape: f32[32,512], index: 3, kind: output, shape index: {}]  }
   0x1   :  { %v41_v0 = vld [vmem:[%s342_s1 + $0x10] sm:$0xff]  ;;  %v39_v1 = vld [vmem:[%s342_s1] sm:$0xff]  ;;  %192 = vset.pattern.permute.xlu1 %v257_v2  ;;  %191 = vset.pattern.permute.xlu0 %v257_v2  ;;  %v42_v3 = vld [vmem:[%s342_s1 + $0x18] sm:$0xff] }
   0x2   :  { %55 = vperm.xlu1 %192, %v41_v0   ;;  %45 = vperm.xlu0 %191, %v39_v1   ;;  %v40_v4 = vld [vmem:[%s342_s1 + $0x8] sm:$0xff] }
   0x3   :  { %8 = vsyncpa [#allocation3], 0  ;;  %v112_v5 = vld [vmem:[%s343_s2 + $0x8] sm:$0xff]  ;;  %v111_v6 = vld [vmem:[%s343_s2] sm:$0xff] }
   0x4   :  { %v114_v7 = vld [vmem:[%s343_s2 + $0x18] sm:$0xff]  ;;  %v113_v8 = vld [vmem:[%s343_s2 + $0x10] sm:$0xff]  ;;  %v19_v9 = vld [vmem:[%s341_s0 + $0x20] sm:$0xff] }
   0x5   :  { %v20_v10 = vld [vmem:[%s341_s0 + $0x28] sm:$0xff]  ;;  %v15_v11 = vld [vmem:[%s341_s0] sm:$0xff]  ;;  %v31_v13 = vunpack.c.l.bf16 %v19_v9  ;;  %v32_v14 = vunpack.c.h.bf16 %v19_v9  ;;  %v21_v17 = vld [vmem:[%s341_s0 + $0x30] sm:$0xff] }
   0x6   :  { %60 = vperm.xlu1 %192, %v42_v3   ;;  %50 = vperm.xlu0 %191, %v40_v4   ;;  %v16_v12 = vld [vmem:[%s341_s0 + $0x8] sm:$0xff]  ;;  %v33_v15 = vunpack.c.l.bf16 %v20_v10  ;;  %v34_v16 = vunpack.c.h.bf16 %v20_v10  ;;  %v23_v18 = vunpack.c.l.bf16 %v15_v11  ;;  %v24_v19 = vunpack.c.h.bf16 %v15_v11  ;;  %v22_v21 = vld [vmem:[%s341_s0 + $0x38] sm:$0xff]  ;;  %v17_v34 = vld [vmem:[%s341_s0 + $0x10] sm:$0xff] }
   0x7   :  { %v25_v20 = vunpack.c.l.bf16 %v16_v12  ;;  %v26_v24 = vunpack.c.h.bf16 %v16_v12  ;;  %v35_v25 = vunpack.c.l.bf16 %v21_v17  ;;  %v36_v32 = vunpack.c.h.bf16 %v21_v17  ;;  %v18_v43 = vld [vmem:[%s341_s0 + $0x18] sm:$0xff]  ;;  %s258_s0 = smov [#allocation2]  }
   0x8   :  { %v37_v33 = vunpack.c.l.bf16 %v22_v21  ;;  %v38_v42 = vunpack.c.h.bf16 %v22_v21  ;;  %v27_v46 = vunpack.c.l.bf16 %v17_v34  ;;  %v28_v50 = vunpack.c.h.bf16 %v17_v34  ;;  %s176_s15 = sshll.u32 %s258_s0, 4  ;;  %s177_s15 = int_to_ptr.vmem [resolvable:$true] %s176_s15 }
   0x9   :  { %v29_v53 = vunpack.c.l.bf16 %v18_v43  ;;  %v30_v56 = vunpack.c.h.bf16 %v18_v43  ;;  %s233_s16 = scalar_lea.vmem %s177_s15, 2048  ;;  %p238_p1 = scmp.lt.s32.totalorder %s177_s15, %s177_s15 }
   0xa   :  { %122 = vperm.xlu1 %192, %v112_v5   ;;  %117 = vperm.xlu0 %191, %v111_v6   ;;  %p234_p0 = scmp.ne.s32.totalorder %s177_s15, %s233_s16  ;;  %p239_p2 = scmp.lt.s32.totalorder %s233_s16, %s233_s16 }
   0xc   :  { %p240_p3 = por %p239_p2, %p238_p1 }
   0xe   :  { %132 = vperm.xlu1 %192, %v114_v7   ;;  %127 = vperm.xlu0 %191, %v113_v8   ;;  %p241_p4 = pnand %p240_p3, %p234_p0 }
  0x81   :  { %v56_v22 = vpop.permute.xlu1 %55  ;;  %v46_v23 = vpop.permute.xlu0 %45 }
  0x82   :  { %v71_v26 = vsub.f32 %v31_v13, %v56_v22  ;;  %v72_v27 = vsub.f32 %v32_v14, %v56_v22  ;;  %v73_v28 = vsub.f32 %v33_v15, %v56_v22  ;;  %v74_v29 = vsub.f32 %v34_v16, %v56_v22 }
  0x83   :  { %v63_v30 = vsub.f32 %v23_v18, %v46_v23  ;;  %v64_v31 = vsub.f32 %v24_v19, %v46_v23  ;;  %v65_v38 = vsub.f32 %v25_v20, %v46_v23  ;;  %v66_v40 = vsub.f32 %v26_v24, %v46_v23 }
  0x84   :  { %v95_v35 = vmul.f32 1.442695, %v71_v26  ;;  %v97_v36 = vmul.f32 1.442695, %v72_v27  ;;  %v99_v37 = vmul.f32 1.442695, %v73_v28 }
  0x85   :  { %v101_v39 = vmul.f32 1.442695, %v74_v29  ;;  %v61_v41 = vpop.permute.xlu1 %60  ;;  %v79_v44 = vmul.f32 1.442695, %v63_v30  ;;  %v81_v47 = vmul.f32 1.442695, %v64_v31  ;;  %v51_v49 = vpop.permute.xlu0 %50 }
  0x86   :  { %193 = vpow2.f32 %v95_v35  ;;  %v75_v45 = vsub.f32 %v35_v25, %v61_v41  ;;  %v76_v48 = vsub.f32 %v36_v32, %v61_v41  ;;  %v83_v51 = vmul.f32 1.442695, %v65_v38 }
  0x87   :  { %195 = vpow2.f32 %v97_v36  ;;  %v77_v52 = vsub.f32 %v37_v33, %v61_v41  ;;  %v85_v54 = vmul.f32 1.442695, %v66_v40  ;;  %v78_v55 = vsub.f32 %v38_v42, %v61_v41 }
  0x88   :  { %197 = vpow2.f32 %v99_v37  ;;  %v103_v57 = vmul.f32 1.442695, %v75_v45  ;;  %v67_v58 = vsub.f32 %v27_v46, %v51_v49  ;;  %v105_v59 = vmul.f32 1.442695, %v76_v48 }
  0x89   :  { %199 = vpow2.f32 %v101_v39  ;;  %v68_v60 = vsub.f32 %v28_v50, %v51_v49  ;;  %v107_v61 = vmul.f32 1.442695, %v77_v52  ;;  %v69_v62 = vsub.f32 %v29_v53, %v51_v49  ;;  %v123_v3 = vpop.permute.xlu1 %122  ;;  %v118_v6 = vpop.permute.xlu0 %117 }
  0x8a   :  { %201 = vpow2.f32 %v79_v44  ;;  %v109_v63 = vmul.f32 1.442695, %v78_v55  ;;  %v70_v0 = vsub.f32 %v30_v56, %v51_v49  ;;  %v87_v1 = vmul.f32 1.442695, %v67_v58 }
  0x8b   :  { %203 = vpow2.f32 %v81_v47  ;;  %v89_v2 = vmul.f32 1.442695, %v68_v60  ;;  %v91_v5 = vmul.f32 1.442695, %v69_v62 }
  0x8c   :  { %205 = vpow2.f32 %v83_v51  ;;  %v93_v8 = vmul.f32 1.442695, %v70_v0 }
  0x8d   :  { %207 = vpow2.f32 %v85_v54  ;;  %v133_v13 = vpop.permute.xlu1 %132  ;;  %v128_v15 = vpop.permute.xlu0 %127 }
  0x8e   :  { %209 = vpow2.f32 %v103_v57 }
  0x8f   :  { %211 = vpow2.f32 %v105_v59 }
  0x90   :  { %v194_v4 = vpop.eup %193  ;;  %213 = vpow2.f32 %v107_v61 }
  0x91   :  { %v196_v7 = vpop.eup %195  ;;  %215 = vpow2.f32 %v109_v63 }
  0x92   :  { %v198_v9 = vpop.eup %197  ;;  %217 = vpow2.f32 %v87_v1 }
  0x93   :  { %v200_v10 = vpop.eup %199  ;;  %219 = vpow2.f32 %v89_v2 }
  0x94   :  { %v202_v11 = vpop.eup %201  ;;  %221 = vpow2.f32 %v91_v5 }
  0x95   :  { %v204_v12 = vpop.eup %203  ;;  %223 = vpow2.f32 %v93_v8 }
  0x96   :  { %v206_v14 = vpop.eup %205  ;;  %225 = vrcp.f32 %v123_v3 }
  0x97   :  { %v208_v16 = vpop.eup %207  ;;  %227 = vrcp.f32 %v118_v6 }
  0x98   :  { %v210_v17 = vpop.eup %209  ;;  %229 = vrcp.f32 %v133_v13 }
  0x99   :  { %v212_v18 = vpop.eup %211  ;;  %231 = vrcp.f32 %v128_v15 }
  0x9a   :  { %v214_v19 = vpop.eup %213 }
  0x9b   :  { %v216_v20 = vpop.eup %215 }
  0x9c   :  { %v218_v21 = vpop.eup %217 }
  0x9d   :  { %v220_v22 = vpop.eup %219 }
  0x9e   :  { %v222_v23 = vpop.eup %221 }
  0x9f   :  { %v224_v24 = vpop.eup %223 }
  0xa0   :  { %v226_v25 = vpop.eup %225 }
  0xa1   :  { %v228_v26 = vpop.eup %227  ;;  %v141_v27 = vmul.f32 %v226_v25, %v218_v21  ;;  %v142_v28 = vmul.f32 %v226_v25, %v220_v22  ;;  %v143_v29 = vmul.f32 %v226_v25, %v222_v23  ;;  %v144_v30 = vmul.f32 %v226_v25, %v224_v24 }
  0xa2   :  { %v230_v31 = vpop.eup %229  ;;  %v136_v32 = vmul.f32 %v228_v26, %v202_v11  ;;  %v137_v33 = vmul.f32 %v228_v26, %v204_v12  ;;  %v138_v34 = vmul.f32 %v228_v26, %v206_v14  ;;  %v139_v35 = vmul.f32 %v228_v26, %v208_v16 }
  0xa3   :  { %v232_v36 = vpop.eup %231  ;;  %159 = vst [vmem:[#allocation2 + $0x20] sm:$0xff] %v141_v27  ;;  %160 = vst [vmem:[#allocation2 + $0x28] sm:$0xff] %v142_v28  ;;  %v151_v37 = vmul.f32 %v230_v31, %v210_v17  ;;  %v152_v38 = vmul.f32 %v230_v31, %v212_v18  ;;  %v153_v39 = vmul.f32 %v230_v31, %v214_v19 }
  0xa4   :  { %161 = vst [vmem:[#allocation2 + $0x30] sm:$0xff] %v143_v29  ;;  %162 = vst [vmem:[#allocation2 + $0x38] sm:$0xff] %v144_v30  ;;  %v154_v40 = vmul.f32 %v230_v31, %v216_v20  ;;  %v146_v41 = vmul.f32 %v232_v36, %v194_v4  ;;  %v147_v42 = vmul.f32 %v232_v36, %v196_v7 }
  0xa5   :  { %155 = vst [vmem:[#allocation2] sm:$0xff] %v136_v32  ;;  %156 = vst [vmem:[#allocation2 + $0x8] sm:$0xff] %v137_v33  ;;  %v148_v43 = vmul.f32 %v232_v36, %v198_v9  ;;  %v149_v44 = vmul.f32 %v232_v36, %v200_v10 }
  0xa6   :  { %157 = vst [vmem:[#allocation2 + $0x10] sm:$0xff] %v138_v34  ;;  %158 = vst [vmem:[#allocation2 + $0x18] sm:$0xff] %v139_v35 }
  0xa7   :  { %167 = vst [vmem:[#allocation2 + $0x60] sm:$0xff] %v151_v37  ;;  %168 = vst [vmem:[#allocation2 + $0x68] sm:$0xff] %v152_v38 }
  0xa8   :  { %169 = vst [vmem:[#allocation2 + $0x70] sm:$0xff] %v153_v39  ;;  %170 = vst [vmem:[#allocation2 + $0x78] sm:$0xff] %v154_v40 }
  0xa9   :  { %163 = vst [vmem:[#allocation2 + $0x40] sm:$0xff] %v146_v41  ;;  %164 = vst [vmem:[#allocation2 + $0x48] sm:$0xff] %v147_v42 }
  0xaa   :  { %165 = vst [vmem:[#allocation2 + $0x50] sm:$0xff] %v148_v43  ;;  %166 = vst [vmem:[#allocation2 + $0x58] sm:$0xff] %v149_v44 }
  0xab   :  { %244 = shalt.err (!%p241_p4)
}
  0xac   :  { %s245_s19 = scalar_lea.hbm %s344_s3, 2048 }
  0xad   :  { %p246_p5 = scmp.ne.s32.totalorder %s344_s3, %s245_s19  ;;  %p249_p6 = scmp.lt.u32.totalorder %s245_s19, %s344_s3 }
  0xaf   :  { %p251_p7 = pnand %p249_p6, %p246_p5 }
  0xb1   :  { %254 = shalt.err (!%p251_p7)
}
  0xb2   :  { %s259_s24 = smov 512   ;;  %s260_s25 = smov 32  }
  0xb3   :  { %182 = dma.vmem_to_hbm [thread:$0]  %s177_s15, 2048, %s344_s3, [#allocation3], %s259_s24, %s259_s24, %s260_s25  }
  0xb4   :  { %255 = dma.done.wait [#allocation3], 2048  }
  0xb5   :  { %256 = vsyncadd [#allocation3], 4294965248 }
  0xb6   :  { %186 = vsyncpa [#allocation3], 1 }

// kernel: mlm_forward.4
= control target key start
LH: loop header
LB: loop body
LE: loop exit
PB: predicated region body
PF: predicated region fallthrough
CT: control target
= control target key end

     0   :  { %v745_v1 = vmov 0   ;;  %vm22_vm0 = vcmask 7168   ;;  %v746_v35 = vmov -inf   ;;  %v69_v36 = vlaneseq  ;;  %s1141_s1 = inlined_call_operand.vmem [shape: bf16[1,128,512], index: 1, kind: input, shape index: {}]   ;;  %s1142_s0 = inlined_call_operand.vmem [shape: bf16[32,128], index: 0, kind: input, shape index: {}]   ;;  %s1143_s4 = inlined_call_operand.vmem [shape: f32[32,1], index: 4, kind: output, shape index: {1}]   ;;  %s1144_s2 = inlined_call_operand.vmem [shape: f32[1,512], index: 2, kind: input, shape index: {}]   ;;  %s1145_s3 = inlined_call_operand.vmem [shape: bf16[32,512], index: 3, kind: output, shape index: {0}]   ;;  %s1146_s5 = inlined_call_operand.vmem [shape: f32[32,1], index: 5, kind: output, shape index: {2}]  }
   0x1   :  { %v655_v0 = vld [vmem:[%s1141_s1 + $0x4] ss:$16 sps:$4 sm:$0xff]   ;;  %293 = vmatprep.mubr.bf16.mxu0 %v745_v1  ;;  %346 = vmatprep.mubr.bf16.mxu1 %v745_v1  ;;  %v657_v2 = vld [vmem:[%s1141_s1 + $0xc] ss:$16 sps:$4 sm:$0xff]   ;;  %v659_v3 = vld [vmem:[%s1141_s1] ss:$16 sps:$4 sm:$0xff]  }
   0x2   :  { %653 = vset.pattern.permute.xlu0 %v745_v1  ;;  %654 = vset.pattern.permute.xlu1 %v745_v1  ;;  %v660_v4 = vld [vmem:[%s1141_s1 + $0x8] ss:$16 sps:$4 sm:$0xff]   ;;  %v661_v5 = vld [vmem:[%s1141_s1 + $0x24] ss:$16 sps:$4 sm:$0xff]   ;;  %v663_v6 = vld [vmem:[%s1141_s1 + $0x2c] ss:$16 sps:$4 sm:$0xff]  }
   0x3   :  { %261 = vmatprep.subr.bf16.mxu0 %v655_v0  ;;  %314 = vmatprep.subr.bf16.mxu1 %v657_v2  ;;  %v665_v7 = vld [vmem:[%s1141_s1 + $0x20] ss:$16 sps:$4 sm:$0xff]   ;;  %v666_v8 = vld [vmem:[%s1141_s1 + $0x28] ss:$16 sps:$4 sm:$0xff]   ;;  %v667_v9 = vld [vmem:[%s1141_s1 + $0x44] ss:$16 sps:$4 sm:$0xff]  }
   0x4   :  { %262 = vmatpush1.bf16.msra.mxu0 %v659_v3  ;;  %315 = vmatpush1.bf16.msra.mxu1 %v660_v4  ;;  %v669_v10 = vld [vmem:[%s1141_s1 + $0x4c] ss:$16 sps:$4 sm:$0xff]   ;;  %v671_v11 = vld [vmem:[%s1141_s1 + $0x40] ss:$16 sps:$4 sm:$0xff]   ;;  %v672_v12 = vld [vmem:[%s1141_s1 + $0x48] ss:$16 sps:$4 sm:$0xff]  }
   0x5   :  { %263 = vmatprep.subr.bf16.mxu0 %v661_v5  ;;  %316 = vmatprep.subr.bf16.mxu1 %v663_v6  ;;  %v673_v13 = vld [vmem:[%s1141_s1 + $0x64] ss:$16 sps:$4 sm:$0xff]   ;;  %v675_v14 = vld [vmem:[%s1141_s1 + $0x6c] ss:$16 sps:$4 sm:$0xff]   ;;  %v677_v15 = vld [vmem:[%s1141_s1 + $0x60] ss:$16 sps:$4 sm:$0xff]  }
   0x6   :  { %v678_v16 = vld [vmem:[%s1141_s1 + $0x68] ss:$16 sps:$4 sm:$0xff]   ;;  %v679_v17 = vld [vmem:[%s1141_s1 + $0x84] ss:$16 sps:$4 sm:$0xff]   ;;  %v681_v18 = vld [vmem:[%s1141_s1 + $0x8c] ss:$16 sps:$4 sm:$0xff]  }
   0x7   :  { %v683_v19 = vld [vmem:[%s1141_s1 + $0x80] ss:$16 sps:$4 sm:$0xff]   ;;  %v684_v20 = vld [vmem:[%s1141_s1 + $0x88] ss:$16 sps:$4 sm:$0xff]   ;;  %v685_v21 = vld [vmem:[%s1141_s1 + $0xa4] ss:$16 sps:$4 sm:$0xff]  }
   0x8   :  { %264 = vmatpush1.bf16.msra.mxu0 %v665_v7  ;;  %317 = vmatpush1.bf16.msra.mxu1 %v666_v8  ;;  %v687_v22 = vld [vmem:[%s1141_s1 + $0xac] ss:$16 sps:$4 sm:$0xff]   ;;  %v689_v23 = vld [vmem:[%s1141_s1 + $0xa0] ss:$16 sps:$4 sm:$0xff]   ;;  %v690_v24 = vld [vmem:[%s1141_s1 + $0xa8] ss:$16 sps:$4 sm:$0xff]  }
   0x9   :  { %265 = vmatprep.subr.bf16.mxu0 %v667_v9  ;;  %318 = vmatprep.subr.bf16.mxu1 %v669_v10  ;;  %v691_v25 = vld [vmem:[%s1141_s1 + $0xc4] ss:$16 sps:$4 sm:$0xff]   ;;  %v693_v26 = vld [vmem:[%s1141_s1 + $0xcc] ss:$16 sps:$4 sm:$0xff]   ;;  %v695_v27 = vld [vmem:[%s1141_s1 + $0xc0] ss:$16 sps:$4 sm:$0xff]  }
   0xa   :  { %v696_v28 = vld [vmem:[%s1141_s1 + $0xc8] ss:$16 sps:$4 sm:$0xff]   ;;  %v697_v29 = vld [vmem:[%s1141_s1 + $0xe4] ss:$16 sps:$4 sm:$0xff]   ;;  %v699_v30 = vld [vmem:[%s1141_s1 + $0xec] ss:$16 sps:$4 sm:$0xff]  }
   0xb   :  { %v701_v31 = vld [vmem:[%s1141_s1 + $0xe0] ss:$16 sps:$4 sm:$0xff]   ;;  %v702_v32 = vld [vmem:[%s1141_s1 + $0xe8] ss:$16 sps:$4 sm:$0xff]   ;;  %23 = vst.msk [vmem:[%s1143_s4] sm:$0xff] %vm22_vm0, %v746_v35  ;;  %24 = vst.msk [vmem:[%s1143_s4 + $0x8] sm:$0xff] %vm22_vm0, %v746_v35 }
   0xc   :  { %266 = vmatpush1.bf16.msra.mxu0 %v671_v11  ;;  %319 = vmatpush1.bf16.msra.mxu1 %v672_v12  ;;  %v703_v33 = vld [vmem:[%s1142_s0] sm:$0xff]   ;;  %v704_v34 = vld [vmem:[%s1142_s0 + $0x8] sm:$0xff]   ;;  %25 = vst.msk [vmem:[%s1143_s4 + $0x10] sm:$0xff] %vm22_vm0, %v746_v35  ;;  %26 = vst.msk [vmem:[%s1143_s4 + $0x18] sm:$0xff] %vm22_vm0, %v746_v35  ;;  %v70_v37 = vshrl.u32 %v69_v36, 7 }
   0xd   :  { %267 = vmatprep.subr.bf16.mxu0 %v673_v13  ;;  %320 = vmatprep.subr.bf16.mxu1 %v675_v14  ;;  %v67_v40 = vld [vmem:[%s1144_s2] sm:$0xf] }
   0xe   :  { %v71_v38 = vsub.s32 0, %v70_v37  ;;  %v79_v39 = vsub.s32 2, %v70_v37  ;;  %v75_v41 = vsub.s32 1, %v70_v37  ;;  %v83_v42 = vsub.s32 3, %v70_v37 }
  0x10   :  { %268 = vmatpush1.bf16.msra.mxu0 %v677_v15  ;;  %321 = vmatpush1.bf16.msra.mxu1 %v678_v16  ;;  %v72_v43 = vrot.slane %v67_v40, %v71_v38  ;;  %v80_v44 = vrot.slane %v67_v40, %v79_v39  ;;  %v76_v45 = vrot.slane %v67_v40, %v75_v41 }
  0x11   :  { %269 = vmatprep.subr.bf16.mxu0 %v679_v17  ;;  %322 = vmatprep.subr.bf16.mxu1 %v681_v18  ;;  %v84_v46 = vrot.slane %v67_v40, %v83_v42 }
  0x14   :  { %270 = vmatpush1.bf16.msra.mxu0 %v683_v19  ;;  %323 = vmatpush1.bf16.msra.mxu1 %v684_v20 }
  0x15   :  { %271 = vmatprep.subr.bf16.mxu0 %v685_v21  ;;  %324 = vmatprep.subr.bf16.mxu1 %v687_v22 }
  0x18   :  { %272 = vmatpush1.bf16.msra.mxu0 %v689_v23  ;;  %325 = vmatpush1.bf16.msra.mxu1 %v690_v24 }
  0x19   :  { %273 = vmatprep.subr.bf16.mxu0 %v691_v25  ;;  %326 = vmatprep.subr.bf16.mxu1 %v693_v26 }
  0x1c   :  { %274 = vmatpush1.bf16.msra.mxu0 %v695_v27  ;;  %327 = vmatpush1.bf16.msra.mxu1 %v696_v28 }
  0x1d   :  { %275 = vmatprep.subr.bf16.mxu0 %v697_v29  ;;  %328 = vmatprep.subr.bf16.mxu1 %v699_v30 }
  0x20   :  { %276 = vmatpush1.bf16.msra.mxu0 %v701_v31  ;;  %329 = vmatpush1.bf16.msra.mxu1 %v702_v32 }
  0x23   :  { %294 = vmatmul.mubr.bf16.vlgmr.msra.gmra.mrb[0].mxu0 %v703_v33  ;;  %347 = vmatmul.mubr.bf16.vlgmr.msra.gmra.mrb[0].mxu1 %v703_v33 }
  0x24   :  { %303 = vmatprep.mubr.bf16.mxu0 %v745_v1  ;;  %356 = vmatprep.mubr.bf16.mxu1 %v745_v1 }
  0x2b   :  { %304 = vmatmul.mubr.bf16.gmra.mrb[4].mxu0 %v704_v34  ;;  %357 = vmatmul.mubr.bf16.gmra.mrb[4].mxu1 %v704_v34 }
  0xf6   :  { %v295_v47 = vpop.f32.mrb[0].mxu0  ;;  %v348_v48 = vpop.f32.mrb[0].mxu1 }
  0xf7   :  { %v296_v49 = vadd.f32 %v295_v47, %v72_v43  ;;  %v349_v50 = vadd.f32 %v348_v48, %v80_v44  ;;  %v297_v51 = vpop.f32.mrb[1].mxu0  ;;  %v350_v52 = vpop.f32.mrb[1].mxu1 }
  0xf8   :  { %v298_v53 = vadd.f32 %v297_v51, %v76_v45  ;;  %v351_v54 = vadd.f32 %v350_v52, %v84_v46  ;;  %v299_v55 = vpop.f32.mrb[2].mxu0  ;;  %v352_v56 = vpop.f32.mrb[2].mxu1 }
  0xf9   :  { %v300_v57 = vadd.f32 %v299_v55, %v72_v43  ;;  %v353_v58 = vadd.f32 %v352_v56, %v80_v44  ;;  %v301_v59 = vpop.f32.mrb[3].mxu0  ;;  %v354_v60 = vpop.f32.mrb[3].mxu1 }
  0xfa   :  { %v642_v61 = vpack.c.bf16 %v298_v53, %v296_v49  ;;  %v643_v62 = vpack.c.bf16 %v351_v54, %v349_v50  ;;  %v302_v63 = vadd.f32 %v301_v59, %v76_v45  ;;  %v355_v0 = vadd.f32 %v354_v60, %v84_v46  ;;  %v1010_v60 = vld [vmem:[%s1143_s4] sm:$0xff] }
  0xfb   :  { %v905_v1 = vpack.c.bf16 %v300_v57, %v296_v49  ;;  %v907_v2 = vpack.c.bf16 %v353_v58, %v349_v50  ;;  %v747_v59 = vmov 0.0  }
  0xfc   :  { %415 = vst [vmem:[%s1145_s3] sm:$0xff] %v642_v61  ;;  %416 = vst [vmem:[%s1145_s3 + $0x8] sm:$0xff] %v643_v62  ;;  %v915_v3 = vpack.c.bf16 %v302_v63, %v298_v53  ;;  %v644_v4 = vpack.c.bf16 %v302_v63, %v300_v57  ;;  %v917_v5 = vpack.c.bf16 %v355_v0, %v351_v54  ;;  %v1018_v63 = vld [vmem:[%s1143_s4 + $0x8] sm:$0xff] }
  0xfd   :  { %v645_v6 = vpack.c.bf16 %v355_v0, %v353_v58  ;;  %v423_v7 = vunpack.c.l.bf16 %v905_v1  ;;  %v427_v8 = vunpack.c.h.bf16 %v905_v1  ;;  %v429_v17 = vunpack.c.h.bf16 %v907_v2  ;;  %27 = vst.msk [vmem:[%s1146_s5] sm:$0xff] %vm22_vm0, %v747_v59  ;;  %28 = vst.msk [vmem:[%s1146_s5 + $0x8] sm:$0xff] %vm22_vm0, %v747_v59 }
  0xfe   :  { %417 = vst [vmem:[%s1145_s3 + $0x10] sm:$0xff] %v644_v4  ;;  %v424_v9 = vunpack.c.l.bf16 %v915_v3  ;;  %v428_v10 = vunpack.c.h.bf16 %v915_v3  ;;  %v305_v11 = vpop.f32.mrb[4].mxu0  ;;  %v358_v12 = vpop.f32.mrb[4].mxu1  ;;  %v425_v27 = vunpack.c.l.bf16 %v907_v2  ;;  %v426_v35 = vunpack.c.l.bf16 %v917_v5  ;;  %29 = vst.msk [vmem:[%s1146_s5 + $0x10] sm:$0xff] %vm22_vm0, %v747_v59 }
  0xff   :  { %418 = vst [vmem:[%s1145_s3 + $0x18] sm:$0xff] %v645_v6  ;;  %v306_v13 = vadd.f32 %v305_v11, %v72_v43  ;;  %v359_v14 = vadd.f32 %v358_v12, %v80_v44  ;;  %v307_v15 = vpop.f32.mrb[5].mxu0  ;;  %v360_v16 = vpop.f32.mrb[5].mxu1  ;;  %v430_v47 = vunpack.c.h.bf16 %v917_v5  ;;  %30 = vst.msk [vmem:[%s1146_s5 + $0x18] sm:$0xff] %vm22_vm0, %v747_v59  ;;  %v1034_v11 = vld [vmem:[%s1143_s4 + $0x10] sm:$0xff] }
 0x100   :  { %v308_v18 = vadd.f32 %v307_v15, %v76_v45  ;;  %v361_v19 = vadd.f32 %v360_v16, %v84_v46  ;;  %v309_v20 = vpop.f32.mrb[6].mxu0  ;;  %v362_v21 = vpop.f32.mrb[6].mxu1  ;;  %v443_v22 = vmax.f32 %v423_v7, %v424_v9  ;;  %v448_v28 = vmax.f32 %v427_v8, %v428_v10  ;;  %v1050_v15 = vld [vmem:[%s1143_s4 + $0x18] sm:$0xff] }
 0x101   :  { %v310_v23 = vadd.f32 %v309_v20, %v72_v43  ;;  %v363_v24 = vadd.f32 %v362_v21, %v80_v44  ;;  %v311_v25 = vpop.f32.mrb[7].mxu0  ;;  %v364_v26 = vpop.f32.mrb[7].mxu1 }
 0x102   :  { %v646_v29 = vpack.c.bf16 %v308_v18, %v306_v13  ;;  %v647_v30 = vpack.c.bf16 %v361_v19, %v359_v14  ;;  %v312_v31 = vadd.f32 %v311_v25, %v76_v45  ;;  %v365_v32 = vadd.f32 %v364_v26, %v84_v46 }
 0x103   :  { %v939_v33 = vpack.c.bf16 %v310_v23, %v306_v13  ;;  %v941_v34 = vpack.c.bf16 %v363_v24, %v359_v14  ;;  %v444_v36 = vmax.f32 %v443_v22, %v425_v27  ;;  %v449_v44 = vmax.f32 %v448_v28, %v429_v17 }
 0x104   :  { %419 = vst [vmem:[%s1145_s3 + $0x20] sm:$0xff] %v646_v29  ;;  %420 = vst [vmem:[%s1145_s3 + $0x28] sm:$0xff] %v647_v30  ;;  %v952_v37 = vpack.c.bf16 %v312_v31, %v308_v18  ;;  %v648_v38 = vpack.c.bf16 %v312_v31, %v310_v23  ;;  %v954_v39 = vpack.c.bf16 %v365_v32, %v361_v19 }
 0x105   :  { %v649_v40 = vpack.c.bf16 %v365_v32, %v363_v24  ;;  %v431_v41 = vunpack.c.l.bf16 %v939_v33  ;;  %v435_v42 = vunpack.c.h.bf16 %v939_v33  ;;  %v445_v43 = vmax.f32 %v444_v36, %v426_v35 }
 0x106   :  { %421 = vst [vmem:[%s1145_s3 + $0x30] sm:$0xff] %v648_v38  ;;  %v432_v45 = vunpack.c.l.bf16 %v952_v37  ;;  %v436_v46 = vunpack.c.h.bf16 %v952_v37  ;;  %v433_v48 = vunpack.c.l.bf16 %v941_v34  ;;  %v450_v51 = vmax.f32 %v449_v44, %v430_v47 }
 0x107   :  { %422 = vst [vmem:[%s1145_s3 + $0x38] sm:$0xff] %v649_v40  ;;  %446 = vmax.xlane.f32.xlu0 %v445_v43  ;;  %v437_v52 = vunpack.c.h.bf16 %v941_v34  ;;  %v434_v53 = vunpack.c.l.bf16 %v954_v39  ;;  %v438_v57 = vunpack.c.h.bf16 %v954_v39 }
 0x108   :  { %v453_v49 = vmax.f32 %v431_v41, %v432_v45  ;;  %v458_v50 = vmax.f32 %v435_v42, %v436_v46 }
 0x10a   :  { %v454_v54 = vmax.f32 %v453_v49, %v433_v48  ;;  %v459_v56 = vmax.f32 %v458_v50, %v437_v52 }
 0x10b   :  { %451 = vmax.xlane.f32.xlu0 %v450_v51 }
 0x10c   :  { %v455_v55 = vmax.f32 %v454_v54, %v434_v53  ;;  %v460_v58 = vmax.f32 %v459_v56, %v438_v57 }
 0x10e   :  { %456 = vmax.xlane.f32.xlu1 %v455_v55 }
 0x112   :  { %461 = vmax.xlane.f32.xlu1 %v460_v58 }
 0x194   :  { %v447_v61 = vpop.xlane.xlu0 %446 }
 0x195   :  { %v1013_v62 = vmax.f32 %v1010_v60, %v447_v61 }
 0x197   :  { %v471_v0 = vsub.f32 %v1010_v60, %v1013_v62  ;;  %584 = vst.msk [vmem:[%s1143_s4] sm:$0xff] %vm22_vm0, %v1013_v62  ;;  %489 = vperm.xlu0 %653, %v1013_v62   ;;  %v467_v60 = vld [vmem:[%s1146_s5] sm:$0xff] }
 0x198   :  { %v452_v4 = vpop.xlane.xlu0 %451 }
 0x199   :  { %v1029_v6 = vmax.f32 %v1018_v63, %v452_v4 }
 0x19b   :  { %v472_v12 = vsub.f32 %v1018_v63, %v1029_v6  ;;  %585 = vst.msk [vmem:[%s1143_s4 + $0x8] sm:$0xff] %vm22_vm0, %v1029_v6  ;;  %494 = vperm.xlu1 %654, %v1029_v6   ;;  %v457_v13 = vpop.xlane.xlu1 %456  ;;  %v468_v6 = vld [vmem:[%s1146_s5 + $0x8] sm:$0xff] }
 0x19c   :  { %v1045_v14 = vmax.f32 %v1034_v11, %v457_v13 }
 0x19e   :  { %v473_v16 = vsub.f32 %v1034_v11, %v1045_v14  ;;  %586 = vst.msk [vmem:[%s1143_s4 + $0x10] sm:$0xff] %vm22_vm0, %v1045_v14 }
 0x19f   :  { %499 = vperm.xlu1 %654, %v1045_v14   ;;  %v462_v18 = vpop.xlane.xlu1 %461 }
 0x1a0   :  { %v1061_v19 = vmax.f32 %v1050_v15, %v462_v18 }
 0x1a2   :  { %v474_v20 = vsub.f32 %v1050_v15, %v1061_v19  ;;  %587 = vst.msk [vmem:[%s1143_s4 + $0x18] sm:$0xff] %vm22_vm0, %v1061_v19 }
 0x1a3   :  { %504 = vperm.xlu1 %654, %v1061_v19  }
 0x216   :  { %v490_v21 = vpop.permute.xlu0 %489 }
 0x217   :  { %v507_v22 = vsub.f32 %v423_v7, %v490_v21  ;;  %v508_v23 = vsub.f32 %v424_v9, %v490_v21  ;;  %v509_v24 = vsub.f32 %v425_v27, %v490_v21  ;;  %v510_v25 = vsub.f32 %v426_v35, %v490_v21 }
 0x219   :  { %v523_v26 = vmul.f32 1.442695, %v507_v22  ;;  %v525_v28 = vmul.f32 1.442695, %v508_v23  ;;  %v527_v29 = vmul.f32 1.442695, %v509_v24 }
 0x21a   :  { %v529_v30 = vmul.f32 1.442695, %v510_v25  ;;  %v495_v31 = vpop.permute.xlu1 %494 }
 0x21b   :  { %705 = vpow2.f32 %v523_v26  ;;  %v511_v32 = vsub.f32 %v427_v8, %v495_v31  ;;  %v512_v7 = vsub.f32 %v428_v10, %v495_v31  ;;  %v513_v9 = vsub.f32 %v429_v17, %v495_v31 }
 0x21c   :  { %707 = vpow2.f32 %v525_v28  ;;  %v514_v27 = vsub.f32 %v430_v47, %v495_v31 }
 0x21d   :  { %709 = vpow2.f32 %v527_v29  ;;  %v531_v5 = vmul.f32 1.442695, %v511_v32  ;;  %v533_v35 = vmul.f32 1.442695, %v512_v7  ;;  %v535_v36 = vmul.f32 1.442695, %v513_v9 }
 0x21e   :  { %711 = vpow2.f32 %v529_v30  ;;  %v537_v38 = vmul.f32 1.442695, %v514_v27  ;;  %v500_v40 = vpop.permute.xlu1 %499  ;;  %v475_v9 = vmul.f32 1.442695, %v471_v0  ;;  %v477_v27 = vmul.f32 1.442695, %v472_v12 }
 0x21f   :  { %713 = vpow2.f32 %v531_v5  ;;  %v515_v1 = vsub.f32 %v431_v41, %v500_v40  ;;  %v516_v3 = vsub.f32 %v432_v45, %v500_v40  ;;  %v517_v2 = vsub.f32 %v433_v48, %v500_v40 }
 0x220   :  { %715 = vpow2.f32 %v533_v35  ;;  %v518_v8 = vsub.f32 %v434_v53, %v500_v40  ;;  %v479_v5 = vmul.f32 1.442695, %v473_v16  ;;  %v481_v35 = vmul.f32 1.442695, %v474_v20  ;;  %v469_v16 = vld [vmem:[%s1146_s5 + $0x10] sm:$0xff] }
 0x221   :  { %717 = vpow2.f32 %v535_v36  ;;  %v539_v10 = vmul.f32 1.442695, %v515_v1  ;;  %v541_v17 = vmul.f32 1.442695, %v516_v3  ;;  %v543_v43 = vmul.f32 1.442695, %v517_v2 }
 0x222   :  { %719 = vpow2.f32 %v537_v38  ;;  %v545_v44 = vmul.f32 1.442695, %v518_v8  ;;  %v505_v47 = vpop.permute.xlu1 %504  ;;  %v470_v1 = vld [vmem:[%s1146_s5 + $0x18] sm:$0xff] }
 0x223   :  { %721 = vpow2.f32 %v539_v10  ;;  %v519_v41 = vsub.f32 %v435_v42, %v505_v47  ;;  %v520_v45 = vsub.f32 %v436_v46, %v505_v47  ;;  %v521_v48 = vsub.f32 %v437_v52, %v505_v47 }
 0x224   :  { %723 = vpow2.f32 %v541_v17  ;;  %v522_v49 = vsub.f32 %v438_v57, %v505_v47 }
 0x225   :  { %v706_v50 = vpop.eup %705  ;;  %725 = vpow2.f32 %v543_v43  ;;  %v547_v51 = vmul.f32 1.442695, %v519_v41  ;;  %v549_v53 = vmul.f32 1.442695, %v520_v45  ;;  %v551_v55 = vmul.f32 1.442695, %v521_v48 }
 0x226   :  { %v708_v54 = vpop.eup %707  ;;  %727 = vpow2.f32 %v545_v44  ;;  %v553_v37 = vmul.f32 1.442695, %v522_v49 }
 0x227   :  { %v710_v56 = vpop.eup %709  ;;  %729 = vpow2.f32 %v547_v51  ;;  %v555_v33 = vadd.f32 %v708_v54, %v706_v50 }
 0x228   :  { %v712_v42 = vpop.eup %711  ;;  %731 = vpow2.f32 %v549_v53 }
 0x229   :  { %v714_v46 = vpop.eup %713  ;;  %v556_v34 = vadd.f32 %v710_v56, %v555_v33  ;;  %733 = vpow2.f32 %v551_v55 }
 0x22a   :  { %v716_v52 = vpop.eup %715  ;;  %735 = vpow2.f32 %v553_v37 }
 0x22b   :  { %v718_v58 = vpop.eup %717  ;;  %v557_v39 = vadd.f32 %v712_v42, %v556_v34  ;;  %v560_v57 = vadd.f32 %v716_v52, %v714_v46  ;;  %737 = vpow2.f32 %v475_v9 }
 0x22c   :  { %v720_v59 = vpop.eup %719  ;;  %739 = vpow2.f32 %v477_v27 }
 0x22d   :  { %v722_v61 = vpop.eup %721  ;;  %558 = vadd.xlane.f32.xlu1 %v557_v39  ;;  %v561_v4 = vadd.f32 %v718_v58, %v560_v57  ;;  %741 = vpow2.f32 %v479_v5 }
 0x22e   :  { %v724_v13 = vpop.eup %723  ;;  %743 = vpow2.f32 %v481_v35 }
 0x22f   :  { %v726_v18 = vpop.eup %725  ;;  %v562_v21 = vadd.f32 %v720_v59, %v561_v4  ;;  %v565_v22 = vadd.f32 %v724_v13, %v722_v61 }
 0x230   :  { %v728_v23 = vpop.eup %727 }
 0x231   :  { %v730_v24 = vpop.eup %729  ;;  %563 = vadd.xlane.f32.xlu0 %v562_v21  ;;  %v566_v25 = vadd.f32 %v726_v18, %v565_v22 }
 0x232   :  { %v732_v26 = vpop.eup %731 }
 0x233   :  { %v567_v28 = vadd.f32 %v728_v23, %v566_v25  ;;  %v570_v29 = vadd.f32 %v732_v26, %v730_v24  ;;  %v734_v30 = vpop.eup %733 }
 0x234   :  { %v736_v32 = vpop.eup %735 }
 0x235   :  { %568 = vadd.xlane.f32.xlu1 %v567_v28  ;;  %v571_v31 = vadd.f32 %v734_v30, %v570_v29  ;;  %v738_v36 = vpop.eup %737 }
 0x236   :  { %v483_v62 = vmul.f32 %v738_v36, %v467_v60  ;;  %v740_v0 = vpop.eup %739 }
 0x237   :  { %v572_v7 = vadd.f32 %v736_v32, %v571_v31  ;;  %v484_v12 = vmul.f32 %v740_v0, %v468_v6  ;;  %v742_v14 = vpop.eup %741 }
 0x238   :  { %v485_v20 = vmul.f32 %v742_v14, %v469_v16  ;;  %v744_v38 = vpop.eup %743 }
 0x239   :  { %573 = vadd.xlane.f32.xlu1 %v572_v7  ;;  %v486_v2 = vmul.f32 %v744_v38, %v470_v1 }
 0x2ba   :  { %v559_v63 = vpop.xlane.xlu1 %558 }
 0x2bb   :  { %v575_v11 = vadd.f32 %v559_v63, %v483_v62 }
 0x2bd   :  { %580 = vst.msk [vmem:[%s1146_s5] sm:$0xff] %vm22_vm0, %v575_v11 }
 0x2be   :  { %v564_v15 = vpop.xlane.xlu0 %563 }
 0x2bf   :  { %v576_v19 = vadd.f32 %v564_v15, %v484_v12 }
 0x2c1   :  { %581 = vst.msk [vmem:[%s1146_s5 + $0x8] sm:$0xff] %vm22_vm0, %v576_v19 }
 0x2c2   :  { %v569_v40 = vpop.xlane.xlu1 %568 }
 0x2c3   :  { %v577_v3 = vadd.f32 %v569_v40, %v485_v20 }
 0x2c5   :  { %582 = vst.msk [vmem:[%s1146_s5 + $0x10] sm:$0xff] %vm22_vm0, %v577_v3 }
 0x2c6   :  { %v574_v8 = vpop.xlane.xlu1 %573 }
 0x2c7   :  { %v578_v10 = vadd.f32 %v574_v8, %v486_v2 }
 0x2c9   :  { %583 = vst.msk [vmem:[%s1146_s5 + $0x18] sm:$0xff] %vm22_vm0, %v578_v10 }

// kernel: mlm_forward.3
= control target key start
LH: loop header
LB: loop body
LE: loop exit
PB: predicated region body
PF: predicated region fallthrough
CT: control target
= control target key end

     0   :  { %s3449_s0 = inlined_call_operand.vmem [shape: bf16[2,16,128], index: 0, kind: input, shape index: {}]   ;;  %s3450_s1 = inlined_call_operand.vmem [shape: bf16[2,128,384], index: 1, kind: input, shape index: {}]   ;;  %s3451_s2 = inlined_call_operand.hbm [shape: bf16[2,128,128], index: 2, kind: input, shape index: {}]   ;;  %s3452_s3 = inlined_call_operand.hbm [shape: bf16[2,128,512], index: 3, kind: input, shape index: {}]   ;;  %s3453_s4 = inlined_call_operand.hbm [shape: bf16[2,512,128], index: 4, kind: input, shape index: {}]   ;;  %s3454_s5 = inlined_call_operand.hbm [shape: f32[2,1,384], index: 5, kind: input, shape index: {}]   ;;  %s3455_s6 = inlined_call_operand.hbm [shape: f32[2,1,512], index: 6, kind: input, shape index: {}]   ;;  %s3456_s7 = inlined_call_operand.vmem [shape: f32[2,8,128], index: 7, kind: input, shape index: {}]   ;;  %s3457_s8 = inlined_call_operand.vmem [shape: bf16[2,16,128], index: 8, kind: output, shape index: {}]  }
   0x1   :  { %3465 = sst [smem:[#allocation17_spill]] %s3452_s3 }
   0x2   :  { %3466 = sst [smem:[#allocation18_spill]] %s3457_s8 }
   0x3   :  { %13 = vsyncpa [#allocation4], 0 }
   0x4   :  { %15 = vsyncpa [#allocation4 + $0x1], 0 }
   0x5   :  { %16 = vsyncpa [#allocation6], 0 }
   0x6   :  { %18 = vsyncpa [#allocation6 + $0x1], 0 }
   0x7   :  { %19 = vsyncpa [#allocation9], 0 }
   0x8   :  { %21 = vsyncpa [#allocation9 + $0x1], 0  ;;  %s2934_s27 = smov 0   ;;  %s2936_s28 = smov 0  }
   0x9   :  { %s2938_s29 = smov 0   ;;  %s2940_s30 = smov 0  }
   0xa LB: > { %3467 = sst [smem:[#allocation14_spill]] %s2871_s29  ;;  %s2953_s9 = sadd.s32 4294967295, %s2875_s30   ;;  %s2875_s30 = sphi %s2940_s30, %s3480_s30   ;;  %s2871_s29 = sphi %s2938_s29, %s3482_s29   ;;  %s2867_s28 = sphi %s2936_s28, %s3484_s28   ;;  %s2863_s27 = sphi %s2934_s27, %s3483_s27  }
   0xb   : > { %s2956_s10 = sadd.s32 1, %s2875_s30   ;;  %s81_s12 = sadd.s32 1, %s2871_s29 }
   0xc   : > { %3468 = sst [smem:[#allocation15_spill]] %s2956_s10  ;;  %s78_s11 = ssub.s32 %s2875_s30, %s2956_s10 }
   0xd   : > { %p79_p0 = scmp.eq.s32.totalorder %s78_s11, 0  ;;  %p88_p1 = scmp.ne.s32.totalorder %s2871_s29, %s2867_s28 }
   0xe   : > { %p89_p2 = scmp.eq.s32.totalorder %s2875_s30, 0  ;;  %p94_p3 = scmp.ne.s32.totalorder %s2867_s28, %s2863_s27 }
   0xf   : > { %s2966_s13 = scalar_select %p79_p0, %s2871_s29, %s81_s12  }
  0x10   : > { %p90_p4 = por %p89_p2, %p88_p1  ;;  %p95_p5 = scmp.eq.s32.totalorder %s2953_s9, 0 }
  0x11   : > { %3469 = sst [smem:[#allocation16_spill]] %s2966_s13  ;;  %p2489_p6 = scmp.lt.s32.totalorder %s2875_s30, 2 }
  0x12   : > { %p2970_p7 = por %p95_p5, %p94_p3  ;;  %s2975_s15 = sand.u32 1, %s2871_s29  }
  0x13   : > { %p2977_p8 = pnand %p2489_p6, %p90_p4  ;;  %s3458_s17 = sand.u32 1, %s2875_s30  }
  0x14   : > { %s3470_s14 = scalar_select %p2970_p7, 1, 0 }
  0x15   : > { %s3471_s16 = scalar_select %p2977_p8, 1, 0 }
  0x16   : > { %s2167_s18 = sshll.u32 %s2975_s15, 8  ;;  %s2293_s19 = sshll.u32 %s2875_s30, 12 }
  0x17   : > { %s305_s20 = scalar_lea.vmem [#allocation5], %s2167_s18  ;;  %s3472_s3 = sld [smem:[#allocation17_spill]] }
  0x18   : > { %s312_s21 = sshll.u32 %s305_s20, 4  ;;  %s2997_s25 = scalar_lea.sflag [#allocation6], %s3458_s17  ;;  %s2993_s21 = int_to_ptr.vmem [resolvable:$true] %s312_s21 }
  0x19   : > { %p3003_p10 = pneg %p2977_p8 }
  0x1d   : > { %s2991_s24 = scalar_lea.hbm %s3472_s3, %s2293_s19  ;;  %s2688_s20 = scalar_lea.hbm %s3472_s3, 8192 }
  0x1e   : > { %s2683_s26 = scalar_lea.hbm %s2991_s24, 4096  ;;  %p2689_p13 = scmp.lt.u32.totalorder %s2991_s24, %s3472_s3 }
  0x1f   : > { %p2684_p9 = scmp.ne.s32.totalorder %s2991_s24, %s2683_s26  ;;  %p2690_p0 = scmp.lt.u32.totalorder %s2688_s20, %s2683_s26 }
  0x20   : > { %p2692_p2 = scmp.lt.u32.totalorder %s2683_s26, %s2991_s24 }
  0x21   : > { %p2686_p11 = pnand %p3003_p10, %p2684_p9  ;;  %p2691_p1 = por %p2690_p0, %p2689_p13 }
  0x23   : > { %p2687_p12 = pneg %p2686_p11  ;;  %p2693_p3 = por %p2692_p2, %p2691_p1 }
  0x25   : > { %p2694_p4 = pnand %p2693_p3, %p2687_p12 }
  0x27   : > { %2697 = shalt.err (!%p2694_p4)
}
  0x28   : > { %s2698_s17 = scalar_lea.vmem %s2993_s21, 4096  ;;  %s2877_s11 = smov [#allocation5]  }
  0x29   : > { %p2699_p5 = scmp.ne.s32.totalorder %s2993_s21, %s2698_s17  ;;  %s2703_s12 = sshll.u32 %s2877_s11, 4  ;;  %s2704_s12 = int_to_ptr.vmem [resolvable:$false] %s2703_s12 }
  0x2a   : > { %s2705_s22 = scalar_lea.vmem %s2704_s12, 8192  ;;  %p2706_p11 = scmp.lt.s32.totalorder %s2993_s21, %s2704_s12 }
  0x2b   : > { %p2701_p6 = pnand %p2699_p5, %p3003_p10  ;;  %p2707_p7 = scmp.lt.s32.totalorder %s2705_s22, %s2698_s17 }
  0x2d   : > { %p2702_p9 = pneg %p2701_p6  ;;  %p2708_p13 = por %p2707_p7, %p2706_p11 }
  0x2f   : > { %p2709_p0 = pnand %p2708_p13, %p2702_p9 }
  0x31   : > { %2712 = shalt.err (!%p2709_p0)
}
  0x32   : > { %s2878_s26 = smov 256   ;;  %s2879_s20 = smov 16  }
  0x33   : > { %2479 = dma.hbm_to_vmem [thread:$0]  (!%p2977_p8), %s2991_s24, 4096, %s2993_s21, %s2997_s25, %s2878_s26, %s2878_s26, %s2879_s20  }
  0x34   : > { %s3032_s11 = scalar_lea.hbm %s3453_s4, %s2293_s19  ;;  %s326_s12 = scalar_lea.vmem [#allocation7], %s2167_s18 }
  0x35   : > { %s333_s22 = sshll.u32 %s326_s12, 4  ;;  %p2177_p7 = scmp.ge.s32.totalorder %s2875_s30, 1  ;;  %s3037_s22 = int_to_ptr.vmem [resolvable:$true] %s333_s22 }
  0x36   : > { %p386_p12 = scmp.lt.s32.totalorder %s2875_s30, 3  ;;  %s2459_s3 = smul.u32 3, %s2975_s15 }
  0x37   : > { %s2460_s21 = smul.u32 48, %s2875_s30  ;;  %s2164_s17 = sshll.u32 %s2975_s15, 6 }
  0x38   : > { %p3041_p1 = pnand %p2177_p7, %p386_p12  ;;  %s347_s18 = scalar_lea.vmem [#allocation8], %s2459_s3 }
  0x39   : > { %s3049_s20 = scalar_lea.hbm %s3454_s5, %s2460_s21  ;;  %s355_s19 = sshll.u32 %s347_s18, 4  ;;  %s3051_s19 = int_to_ptr.vmem [resolvable:$true] %s355_s19 }
  0x3a   : > { %s3474_s13 = scalar_select %p3041_p1, 1, 0 }
  0x3b   : > { %s3475_s23 = sand.u32 1, %s2875_s30   ;;  %s2713_s29 = scalar_lea.hbm %s3049_s20, 48 }
  0x3c   : > { %s3056_s12 = scalar_lea.sflag [#allocation9], %s3475_s23  ;;  %p2714_p2 = scmp.ne.s32.totalorder %s3049_s20, %s2713_s29 }
  0x3d   : > { %s2718_s26 = scalar_lea.hbm %s3454_s5, 96  ;;  %p2719_p5 = scmp.lt.u32.totalorder %s3049_s20, %s3454_s5 }
  0x3e   : > { %p2716_p3 = pnand %p2714_p2, %p3003_p10  ;;  %p2720_p6 = scmp.lt.u32.totalorder %s2718_s26, %s2713_s29 }
  0x3f   : > { %p2722_p11 = scmp.lt.u32.totalorder %s2713_s29, %s3049_s20 }
  0x40   : > { %p2717_p4 = pneg %p2716_p3  ;;  %p2721_p9 = por %p2720_p6, %p2719_p5 }
  0x42   : > { %p2723_p13 = por %p2722_p11, %p2721_p9 }
  0x44   : > { %p2724_p0 = pnand %p2723_p13, %p2717_p4 }
  0x46   : > { %2727 = shalt.err (!%p2724_p0)
}
  0x47   : > { %s2728_s3 = scalar_lea.vmem %s3051_s19, 48  ;;  %s2880_s18 = smov [#allocation8]  }
  0x48   : > { %p2729_p7 = scmp.ne.s32.totalorder %s3051_s19, %s2728_s3  ;;  %s2733_s23 = sshll.u32 %s2880_s18, 4  ;;  %s2734_s23 = int_to_ptr.vmem [resolvable:$false] %s2733_s23 }
  0x49   : > { %s2735_s8 = scalar_lea.vmem %s2734_s23, 96  ;;  %p2736_p3 = scmp.lt.s32.totalorder %s3051_s19, %s2734_s23 }
  0x4a   : > { %p2731_p12 = pnand %p2729_p7, %p3003_p10  ;;  %p2737_p1 = scmp.lt.s32.totalorder %s2735_s8, %s2728_s3 }
  0x4c   : > { %p2732_p2 = pneg %p2731_p12  ;;  %p2738_p5 = por %p2737_p1, %p2736_p3 }
  0x4e   : > { %p2739_p6 = pnand %p2738_p5, %p2732_p2 }
  0x50   : > { %2742 = shalt.err (!%p2739_p6)
}
  0x51   : > { %2485 = dma.hbm_to_vmem [thread:$0]  (!%p2977_p8), %s3049_s20, 48, %s3051_s19, %s3056_s12  }
  0x52   : > { %s2292_s29 = sshll.u32 %s2875_s30, 10  ;;  %s284_s26 = scalar_lea.vmem [#allocation3], %s2164_s17 }
  0x53   : > { %s3084_s21 = scalar_lea.hbm %s3451_s2, %s2292_s29  ;;  %s291_s3 = sshll.u32 %s284_s26, 4  ;;  %s3088_s3 = int_to_ptr.vmem [resolvable:$true] %s291_s3 }
  0x54   : > { %s2174_s18 = sshll.u32 %s2975_s15, 2  ;;  %s281_s23 = scalar_lea.sflag [#allocation4], %s2975_s15 }
  0x55   : > { %s2743_s8 = scalar_lea.hbm %s3084_s21, 1024  ;;  %s2748_s29 = scalar_lea.hbm %s3451_s2, 2048 }
  0x56   : > { %p2744_p1 = scmp.ne.s32.totalorder %s3084_s21, %s2743_s8  ;;  %p2749_p11 = scmp.lt.u32.totalorder %s3084_s21, %s3451_s2 }
  0x57   : > { %p2750_p13 = scmp.lt.u32.totalorder %s2748_s29, %s2743_s8  ;;  %p2752_p7 = scmp.lt.u32.totalorder %s2743_s8, %s3084_s21 }
  0x58   : > { %p2746_p4 = pnand %p2744_p1, %p3003_p10 }
  0x59   : > { %p2751_p0 = por %p2750_p13, %p2749_p11 }
  0x5a   : > { %p2747_p9 = pneg %p2746_p4 }
  0x5b   : > { %p2753_p12 = por %p2752_p7, %p2751_p0 }
  0x5d   : > { %p2754_p2 = pnand %p2753_p12, %p2747_p9 }
  0x5f   : > { %2757 = shalt.err (!%p2754_p2)
}
  0x60   : > { %s2758_s17 = scalar_lea.vmem %s3088_s3, 1024  ;;  %s2881_s26 = smov [#allocation3]  }
  0x61   : > { %p2759_p3 = scmp.ne.s32.totalorder %s3088_s3, %s2758_s17  ;;  %s2763_s20 = sshll.u32 %s2881_s26, 4  ;;  %s2764_s20 = int_to_ptr.vmem [resolvable:$false] %s2763_s20 }
  0x62   : > { %s2765_s19 = scalar_lea.vmem %s2764_s20, 2048  ;;  %p2766_p1 = scmp.lt.s32.totalorder %s3088_s3, %s2764_s20 }
  0x63   : > { %p2761_p5 = pnand %p2759_p3, %p3003_p10  ;;  %p2767_p4 = scmp.lt.s32.totalorder %s2765_s19, %s2758_s17 }
  0x65   : > { %p2762_p6 = pneg %p2761_p5  ;;  %p2768_p11 = por %p2767_p4, %p2766_p1 }
  0x67   : > { %p2769_p13 = pnand %p2768_p11, %p2762_p6 }
  0x69   : > { %2772 = shalt.err (!%p2769_p13)
}
  0x6a   : > { %s2882_s8 = smov 64   ;;  %s2883_s29 = smov 4  }
  0x6b   : > { %2476 = dma.hbm_to_vmem [thread:$0]  (!%p2977_p8), %s3084_s21, 1024, %s3088_s3, %s281_s23, %s2882_s8, %s2882_s8, %s2883_s29  }
  0x6c   : > { %s2773_s10 = scalar_lea.hbm %s3032_s11, 4096  ;;  %s2778_s26 = scalar_lea.hbm %s3453_s4, 8192 }
  0x6d   : > { %p2774_p9 = scmp.ne.s32.totalorder %s3032_s11, %s2773_s10  ;;  %p2779_p12 = scmp.lt.u32.totalorder %s3032_s11, %s3453_s4 }
  0x6e   : > { %p2780_p2 = scmp.lt.u32.totalorder %s2778_s26, %s2773_s10  ;;  %p2782_p5 = scmp.lt.u32.totalorder %s2773_s10, %s3032_s11 }
  0x6f   : > { %p2776_p0 = pnand %p2774_p9, %p3003_p10 }
  0x70   : > { %p2781_p3 = por %p2780_p2, %p2779_p12 }
  0x71   : > { %p2777_p7 = pneg %p2776_p0 }
  0x72   : > { %p2783_p6 = por %p2782_p5, %p2781_p3 }
  0x74   : > { %p2784_p1 = pnand %p2783_p6, %p2777_p7 }
  0x76   : > { %2787 = shalt.err (!%p2784_p1)
}
  0x77   : > { %s2788_s21 = scalar_lea.vmem %s3037_s22, 4096  ;;  %s2884_s3 = smov [#allocation7]  }
  0x78   : > { %p2789_p4 = scmp.ne.s32.totalorder %s3037_s22, %s2788_s21  ;;  %s2793_s23 = sshll.u32 %s2884_s3, 4  ;;  %s2794_s23 = int_to_ptr.vmem [resolvable:$false] %s2793_s23 }
  0x79   : > { %s2795_s24 = scalar_lea.vmem %s2794_s23, 8192  ;;  %p2796_p9 = scmp.lt.s32.totalorder %s3037_s22, %s2794_s23 }
  0x7a   : > { %p2791_p11 = pnand %p2789_p4, %p3003_p10  ;;  %p2797_p0 = scmp.lt.s32.totalorder %s2795_s24, %s2788_s21 }
  0x7c   : > { %p2792_p13 = pneg %p2791_p11  ;;  %p2798_p12 = por %p2797_p0, %p2796_p9 }
  0x7e   : > { %p2799_p2 = pnand %p2798_p12, %p2792_p13 }
  0x80   : > { %2802 = shalt.err (!%p2799_p2)
}
  0x81   : > { %2482 = dma.hbm_to_vmem [thread:$0]  (!%p2977_p8), %s3032_s11, 4096, %s3037_s22, %s2997_s25, %s2882_s8, %s2882_s8, %s2883_s29  }
  0x82   : > { %s2295_s10 = sshll.u32 %s2875_s30, 6  ;;  %s366_s19 = scalar_lea.vmem [#allocation10], %s2174_s18 }
  0x83   : > { %s3147_s20 = scalar_lea.hbm %s3455_s6, %s2295_s10  ;;  %s374_s21 = sshll.u32 %s366_s19, 4  ;;  %s375_s21 = int_to_ptr.vmem [resolvable:$true] %s374_s21 }
  0x84   : > { %s2803_s3 = scalar_lea.hbm %s3147_s20, 64  ;;  %s2808_s11 = scalar_lea.hbm %s3455_s6, 128 }
  0x85   : > { %p2804_p7 = scmp.ne.s32.totalorder %s3147_s20, %s2803_s3  ;;  %p2809_p6 = scmp.lt.u32.totalorder %s3147_s20, %s3455_s6 }
  0x86   : > { %p2810_p1 = scmp.lt.u32.totalorder %s2808_s11, %s2803_s3  ;;  %p2812_p11 = scmp.lt.u32.totalorder %s2803_s3, %s3147_s20 }
  0x87   : > { %p2806_p3 = pnand %p2804_p7, %p3003_p10 }
  0x88   : > { %p2811_p4 = por %p2810_p1, %p2809_p6 }
  0x89   : > { %p2807_p5 = pneg %p2806_p3 }
  0x8a   : > { %p2813_p13 = por %p2812_p11, %p2811_p4 }
  0x8c   : > { %p2814_p9 = pnand %p2813_p13, %p2807_p5 }
  0x8e   : > { %2817 = shalt.err (!%p2814_p9)
}
  0x8f   : > { %s2818_s15 = scalar_lea.vmem %s375_s21, 64  ;;  %s2885_s18 = smov [#allocation10]  }
  0x90   : > { %p2819_p0 = scmp.ne.s32.totalorder %s375_s21, %s2818_s15  ;;  %s2823_s29 = sshll.u32 %s2885_s18, 4  ;;  %s2824_s29 = int_to_ptr.vmem [resolvable:$false] %s2823_s29 }
  0x91   : > { %s2825_s23 = scalar_lea.vmem %s2824_s29, 128  ;;  %p2826_p7 = scmp.lt.s32.totalorder %s375_s21, %s2824_s29 }
  0x92   : > { %p2821_p12 = pnand %p2819_p0, %p3003_p10  ;;  %p2827_p3 = scmp.lt.s32.totalorder %s2825_s23, %s2818_s15 }
  0x94   : > { %p2822_p2 = pneg %p2821_p12  ;;  %p2828_p8 = por %p2827_p3, %p2826_p7 }
  0x96   : > { %p2829_p1 = pnand %p2828_p8, %p2822_p2 }
  0x98   : > { %2832 = shalt.err (!%p2829_p1)
}
  0x99   : > { %p3476_p6 = scmp.ne.s32.totalorder %s3471_s16, 0  ;;  %p3477_p5 = scmp.ne.s32.totalorder %s3474_s13, 0 }
  0x9a   : > { %s392_s27 = sand.u32 (!%p3477_p5), 1, %s2867_s28   ;;  %p3478_p10 = scmp.ne.s32.totalorder (!%p3477_p5), %s3470_s14, 0 }
  0x9b   : > { %2488 = dma.hbm_to_vmem [thread:$0]  (!%p3476_p6), %s3147_s20, 64, %s375_s21, %s3056_s12  }
  0x9c   : > { %390 = sbr.rel (%p3477_p5) target bundleno = 2495 (0x9bf), region = 52  ;;  %s2178_s24 = sshll.u32 (!%p3477_p5), %s392_s27, 6 }
  0x9d   : > { %s393_s10 = scalar_lea.sflag (!%p3477_p5), [#allocation4], %s392_s27  ;;  %s3172_s17 = scalar_lea.vmem (!%p3477_p5), [#allocation3], %s2178_s24 }
  0xa3   : > { %2850 = dma.done.wait (%p3478_p10), %s393_s10, 1024  }
  0xa4   : > { %2852 = vsyncadd (%p3478_p10), %s393_s10, 4294966272  ;;  %s401_s16 = sand.u32 1, %s2953_s9   ;;  %s2179_s26 = sshll.u32 %s392_s27, 8 }
  0xa5   : > { %s402_s12 = scalar_lea.sflag [#allocation6], %s401_s16  ;;  %s3179_s20 = scalar_lea.vmem [#allocation5], %s2179_s26 }
  0xa6   : > { %2854 = dma.done.wait (%p3478_p10), %s402_s12, 8192  }
  0xa7   : > { %2856 = vsyncadd (%p3478_p10), %s402_s12, 4294959104  ;;  %s2461_s13 = smul.u32 3, %s392_s27  ;;  %s3185_s19 = scalar_lea.vmem [#allocation7], %s2179_s26 }
  0xa8   : > { %s420_s21 = scalar_lea.sflag [#allocation9], %s401_s16 }
  0xa9   : > { %s3187_s3 = scalar_lea.vmem [#allocation8], %s2461_s13 }
  0xaa   : > { %2858 = dma.done.wait (%p3478_p10), %s420_s21, 112  }
  0xab   : > { %2860 = vsyncadd (%p3478_p10), %s420_s21, 4294967184  ;;  %s2181_s25 = sshll.u32 %s392_s27, 2  ;;  %p489_p8 = scmp.lt.s32.totalorder %s2953_s9, 1 }
  0xac   : > { %s3205_s10 = scalar_lea.vmem [#allocation10], %s2181_s25  ;;  %p2184_p4 = scmp.ne.s32.totalorder %s2953_s9, 0 }
  0xad   : > { %s490_s30 = scalar_select %p489_p8, %s2953_s9, 1 }
  0xae   : > { %502 = sbr.rel (%p2184_p4) target bundleno = 181 (0xb5), region = 76  ;;  %v2529_v0 = vld [vmem:[%s3449_s0] sm:$0xff] (!%p2184_p4)   ;;  %v2530_v1 = vld [vmem:[%s3449_s0 + $0x8] sm:$0xff] (!%p2184_p4)  }
  0xaf   : > { %s2462_s11 = smul.u32 192, %s490_s30  ;;  %s2183_s22 = sshll.u32 %s490_s30, 3  ;;  %519 = vst [vmem:[#allocation2] sm:$0xff] (!%p2184_p4), %v2529_v0  ;;  %520 = vst [vmem:[#allocation2 + $0x8] sm:$0xff] (!%p2184_p4), %v2530_v1 }
  0xb0   : > { %s3198_s18 = scalar_lea.vmem %s3456_s7, %s2183_s22 }
  0xb1   : > { %s3203_s24 = scalar_lea.vmem %s3450_s1, %s2462_s11 }
  0xb5 PF: > { %v2531_v2 = vld [vmem:[%s3203_s24 + $0x4] ss:$12 sps:$4 sm:$0xff]   ;;  %v2533_v3 = vld [vmem:[%s3203_s24] ss:$12 sps:$4 sm:$0xff]   ;;  %v2886_v4 = vmov 0   ;;  %v2887_v21 = vmov 0.0   ;;  %v562_v22 = vlaneseq }
  0xb6   : > { %737 = vmatprep.mubr.bf16.mxu0 %v2886_v4  ;;  %705 = vmatprep.subr.bf16.mxu0 %v2531_v2  ;;  %v2534_v5 = vld [vmem:[%s3203_s24 + $0x1c] ss:$12 sps:$4 sm:$0xff]   ;;  %v2536_v6 = vld [vmem:[%s3203_s24 + $0x18] ss:$12 sps:$4 sm:$0xff]   ;;  %v2537_v7 = vld [vmem:[%s3203_s24 + $0x34] ss:$12 sps:$4 sm:$0xff]  }
  0xb7   : > { %706 = vmatpush1.bf16.msra.mxu0 %v2533_v3  ;;  %v2539_v8 = vld [vmem:[%s3203_s24 + $0x30] ss:$12 sps:$4 sm:$0xff]   ;;  %v2540_v9 = vld [vmem:[%s3203_s24 + $0x4c] ss:$12 sps:$4 sm:$0xff]   ;;  %v3222_v10 = vld [vmem:[#allocation2] sm:$0xff]  ;;  %vm2888_vm0 = vmmov 0  }
  0xb8   : > { %707 = vmatprep.subr.bf16.mxu0 %v2534_v5  ;;  %v2542_v11 = vld [vmem:[%s3203_s24 + $0x48] ss:$12 sps:$4 sm:$0xff]   ;;  %v2543_v12 = vld [vmem:[%s3203_s24 + $0x64] ss:$12 sps:$4 sm:$0xff]   ;;  %2411 = vmatprep.mubr.bf16.mxu1 %v3222_v10  ;;  %v2545_v13 = vld [vmem:[%s3203_s24 + $0x60] ss:$12 sps:$4 sm:$0xff]  }
  0xb9   : > { %v2546_v14 = vld [vmem:[%s3203_s24 + $0x7c] ss:$12 sps:$4 sm:$0xff]   ;;  %v2548_v15 = vld [vmem:[%s3203_s24 + $0x78] ss:$12 sps:$4 sm:$0xff]   ;;  %v2549_v16 = vld [vmem:[%s3203_s24 + $0x94] ss:$12 sps:$4 sm:$0xff]  }
  0xba   : > { %v2551_v17 = vld [vmem:[%s3203_s24 + $0x90] ss:$12 sps:$4 sm:$0xff]   ;;  %v2552_v18 = vld [vmem:[%s3203_s24 + $0xac] ss:$12 sps:$4 sm:$0xff]   ;;  %v2554_v19 = vld [vmem:[%s3203_s24 + $0xa8] ss:$12 sps:$4 sm:$0xff]  }
  0xbb   : > { %708 = vmatpush1.bf16.msra.mxu0 %v2536_v6  ;;  %v3236_v20 = vld [vmem:[#allocation2 + $0x8] sm:$0xff]  ;;  %v3242_v23 = vshrl.u32 %v562_v22, 7  ;;  %v3248_v25 = vld [vmem:[%s3187_s3] sm:$0x7]  ;;  %v2557_v55 = vld [vmem:[%s3203_s24 + $0x38] ss:$12 sps:$4 sm:$0xff]  }
  0xbc   : > { %709 = vmatprep.subr.bf16.mxu0 %v2537_v7  ;;  %v2555_v53 = vld [vmem:[%s3203_s24 + $0x8] ss:$12 sps:$4 sm:$0xff]   ;;  %v2556_v54 = vld [vmem:[%s3203_s24 + $0x20] ss:$12 sps:$4 sm:$0xff]   ;;  %v2558_v56 = vld [vmem:[%s3203_s24 + $0x50] ss:$12 sps:$4 sm:$0xff]  }
  0xbd   : > { %v3245_v24 = vsub.s32 0, %v3242_v23  ;;  %v3251_v26 = vsub.s32 1, %v3242_v23  ;;  %2395 = vmatprep.subr.bf16.mxu1 %v2555_v53  ;;  %v2559_v57 = vld [vmem:[%s3203_s24 + $0x68] ss:$12 sps:$4 sm:$0xff]   ;;  %v2560_v58 = vld [vmem:[%s3203_s24 + $0x80] ss:$12 sps:$4 sm:$0xff]  }
  0xbe   : > { %2396 = vmatpush3.bf16.msra.mxu1 %v2555_v53  ;;  %v2561_v59 = vld [vmem:[%s3203_s24 + $0x98] ss:$12 sps:$4 sm:$0xff]   ;;  %v2562_v60 = vld [vmem:[%s3203_s24 + $0xb0] ss:$12 sps:$4 sm:$0xff]   ;;  %vm899_vm1 = vcmask 130048   ;;  %p2285_p11 = scmp.ne.s32.totalorder %s2953_s9, 1 }
  0xbf   : > { %710 = vmatpush1.bf16.msra.mxu0 %v2539_v8  ;;  %v565_v27 = vrot.slane %v3248_v25, %v3245_v24  ;;  %v569_v29 = vrot.slane %v3248_v25, %v3251_v26  ;;  %2397 = vmatprep.subr.bf16.mxu1 %v2556_v54 }
  0xc0   : > { %711 = vmatprep.subr.bf16.mxu0 %v2540_v9 }
  0xc2   : > { %2398 = vmatpush3.bf16.msra.mxu1 %v2556_v54 }
  0xc3   : > { %712 = vmatpush1.bf16.msra.mxu0 %v2542_v11  ;;  %2399 = vmatprep.subr.bf16.mxu1 %v2557_v55 }
  0xc4   : > { %713 = vmatprep.subr.bf16.mxu0 %v2543_v12 }
  0xc6   : > { %2400 = vmatpush3.bf16.msra.mxu1 %v2557_v55 }
  0xc7   : > { %714 = vmatpush1.bf16.msra.mxu0 %v2545_v13  ;;  %2401 = vmatprep.subr.bf16.mxu1 %v2558_v56 }
  0xc8   : > { %715 = vmatprep.subr.bf16.mxu0 %v2546_v14 }
  0xca   : > { %2402 = vmatpush3.bf16.msra.mxu1 %v2558_v56 }
  0xcb   : > { %716 = vmatpush1.bf16.msra.mxu0 %v2548_v15  ;;  %2403 = vmatprep.subr.bf16.mxu1 %v2559_v57 }
  0xcc   : > { %717 = vmatprep.subr.bf16.mxu0 %v2549_v16 }
  0xce   : > { %2404 = vmatpush3.bf16.msra.mxu1 %v2559_v57  ;;  %v2564_v57 = vld [vmem:[%s3172_s17 + $0x8] sm:$0xff]  }
  0xcf   : > { %718 = vmatpush1.bf16.msra.mxu0 %v2551_v17  ;;  %2405 = vmatprep.subr.bf16.mxu1 %v2560_v58 }
  0xd0   : > { %719 = vmatprep.subr.bf16.mxu0 %v2552_v18 }
  0xd2   : > { %2406 = vmatpush3.bf16.msra.mxu1 %v2560_v58 }
  0xd3   : > { %720 = vmatpush1.bf16.msra.mxu0 %v2554_v19  ;;  %2407 = vmatprep.subr.bf16.mxu1 %v2561_v59 }
  0xd4   : > { %2415 = vmatprep.subr.bf16.mxu0 %v2887_v21 }
  0xd6   : > { %738 = vmatmul.mubr.bf16.vlgmr.msra.gmra.mrb[0].mxu0 %v3222_v10  ;;  %2408 = vmatpush3.bf16.msra.mxu1 %v2561_v59  ;;  %v2565_v59 = vld [vmem:[%s3172_s17 + $0x10] sm:$0xff]  }
  0xd7   : > { %747 = vmatprep.mubr.bf16.mxu0 %v2886_v4  ;;  %2409 = vmatprep.subr.bf16.mxu1 %v2562_v60 }
  0xda   : > { %2410 = vmatpush3.bf16.msra.mxu1 %v2562_v60 }
  0xdb   : > { %2427 = vmatprep.subr.bf16.mxu1 %v2887_v21 }
  0xdd   : > { %2412 = vmatmul.mubr.bf16.vlgmr.msra.gmra.mrb[0].mxu1 %v3236_v20 }
  0xde   : > { %748 = vmatmul.mubr.bf16.gmra.mrb[4].mxu0 %v3236_v20  ;;  %2429 = vmatprep.mubr.msk.bf16.mxu1 %vm2888_vm0, %v2887_v21 }
  0xdf   : > { %2417 = vmatprep.mubr.msk.bf16.mxu0 %vm2888_vm0, %v2887_v21 }
 0x1a9   : > { %v739_v28 = vpop.f32.mrb[0].mxu0 }
 0x1aa   : > { %v740_v30 = vadd.f32 %v739_v28, %v565_v27  ;;  %v741_v31 = vpop.f32.mrb[1].mxu0 }
 0x1ab   : > { %v743_v32 = vpop.f32.mrb[2].mxu0  ;;  %v742_v35 = vadd.f32 %v741_v31, %v569_v29 }
 0x1ac   : > { %v744_v33 = vadd.f32 %v743_v32, %v565_v27  ;;  %v745_v34 = vpop.f32.mrb[3].mxu0  ;;  %v807_v37 = vmul.f32 0.088388346, %v740_v30 }
 0x1ad   : > { %v746_v36 = vadd.f32 %v745_v34, %v569_v29 }
 0x1ae   : > { %v808_v38 = vmul.f32 0.088388346, %v744_v33 }
 0x1af   : > { %v813_v39 = vpack.c.bf16 %v746_v36, %v742_v35  ;;  %v3284_v36 = vsub.s32 2, %v3242_v23 }
 0x1b0   : > { %v811_v40 = vpack.c.bf16 %v808_v38, %v807_v37  ;;  %v2413_v37 = vpop.f32.mrb[0].mxu1 }
 0x1b1   : > { %v749_v41 = vpop.f32.mrb[4].mxu0  ;;  %2416 = vmatpush3.bf16.xpose.msra.mxu0 %v813_v39  ;;  %v792_v38 = vpop.f32.mrb[1].mxu1  ;;  %v573_v39 = vrot.slane %v3248_v25, %v3284_v36 }
 0x1b2   : > { %v750_v42 = vadd.f32 %v749_v41, %v565_v27  ;;  %v751_v43 = vpop.f32.mrb[5].mxu0  ;;  %2421 = vmatprep.subr.bf16.mxu0 %v2887_v21 }
 0x1b3   : > { %v753_v44 = vpop.f32.mrb[6].mxu0  ;;  %v752_v47 = vadd.f32 %v751_v43, %v569_v29 }
 0x1b4   : > { %v754_v45 = vadd.f32 %v753_v44, %v565_v27  ;;  %v755_v46 = vpop.f32.mrb[7].mxu0  ;;  %v809_v49 = vmul.f32 0.088388346, %v750_v42  ;;  %v793_v42 = vadd.f32 %v792_v38, %v573_v39  ;;  %v526_v38 = vunpack.c.h.bf16 %v3236_v20 }
 0x1b5   : > { %v756_v48 = vadd.f32 %v755_v46, %v569_v29 }
 0x1b6   : > { %v810_v50 = vmul.f32 0.088388346, %v754_v45  ;;  %v801_v45 = vadd.f32 %v2413_v37, %v573_v39 }
 0x1b7   : > { %v814_v51 = vpack.c.bf16 %v756_v48, %v752_v47  ;;  %v2563_v48 = vld [vmem:[%s3172_s17] sm:$0xff]  }
 0x1b8   : > { %v812_v52 = vpack.c.bf16 %v810_v50, %v809_v49  ;;  %2418 = vmatmul.mubr.bf16.vlgmr.msra.gmra.mrb[8].mxu0 %v811_v40  ;;  %v2414_v40 = vpop.f32.mrb[2].mxu1 }
 0x1b9   : > { %2422 = vmatpush3.bf16.xpose.msra.mxu0 %v814_v51  ;;  %2423 = vmatprep.mubr.msk.bf16.mxu0 %vm2888_vm0, %v2887_v21  ;;  %v795_v41 = vpop.f32.mrb[3].mxu1  ;;  %v804_v46 = vadd.f32 %v2414_v40, %v573_v39  ;;  %v2571_v40 = vld [vmem:[%s3179_s20] ss:$16 sps:$4 sm:$0xff]  }
 0x1ba   : > { %2433 = vmatprep.subr.bf16.mxu0 %v2887_v21  ;;  %v796_v43 = vadd.f32 %v795_v41, %v573_v39  ;;  %v2573_v41 = vld [vmem:[%s3179_s20 + $0x4] ss:$16 sps:$4 sm:$0xff]  }
 0x1bb   : > { %v816_v47 = vpack.c.bf16 %v804_v46, %v801_v45  ;;  %v2582_v45 = vld [vmem:[%s3179_s20 + $0x2c] ss:$16 sps:$4 sm:$0xff]   ;;  %v2577_v46 = vld [vmem:[%s3179_s20 + $0x20] ss:$16 sps:$4 sm:$0xff]  }
 0x1bc   : > { %v815_v44 = vpack.c.bf16 %v796_v43, %v793_v42  ;;  %v2574_v42 = vld [vmem:[%s3179_s20 + $0x8] ss:$16 sps:$4 sm:$0xff]   ;;  %v2576_v43 = vld [vmem:[%s3179_s20 + $0xc] ss:$16 sps:$4 sm:$0xff]  }
 0x1be   : > { %2428 = vmatpush3.bf16.msra.mxu1 %v815_v44  ;;  %v2579_v44 = vld [vmem:[%s3179_s20 + $0x24] ss:$16 sps:$4 sm:$0xff]  }
 0x1bf   : > { %2439 = vmatprep.subr.bf16.mxu1 %v2563_v48 }
 0x1c0   : > { %2424 = vmatmul.mubr.bf16.vlgmr.msra.gmra.mrb[12].mxu0 %v812_v52 }
 0x1c1   : > { %2435 = vmatprep.mubr.msk.bf16.mxu0 %vm2888_vm0, %v2887_v21  ;;  %2434 = vmatpush3.bf16.msra.mxu0 %v816_v47  ;;  %v2580_v47 = vld [vmem:[%s3179_s20 + $0x28] ss:$16 sps:$4 sm:$0xff]  }
 0x1c2   : > { %1434 = vmatprep.subr.bf16.mxu0 %v2573_v41 }
 0x28b   : > { %v851_v61 = vpop.f32.mrb[8].mxu0 }
 0x28c   : > { %v2419_v62 = vpop.f32.mrb[9].mxu0  ;;  %v900_v63 = vsel %vm899_vm1, %v851_v61, -inf }
 0x28d   : > { %901 = vmax.xlane.f32.xlu0 %v900_v63  ;;  %v854_v0 = vpop.f32.mrb[10].mxu0 }
 0x28e   : > { %v2420_v1 = vpop.f32.mrb[11].mxu0  ;;  %v903_v2 = vsel %vm899_vm1, %v854_v0, -inf }
 0x28f   : > { %v2567_v1 = vld [vmem:[%s3172_s17 + $0x20] sm:$0xff]  }
 0x291   : > { %904 = vmax.xlane.f32.xlu0 %v903_v2  ;;  %v2568_v2 = vld [vmem:[%s3172_s17 + $0x28] sm:$0xff]  }
 0x293   : > { %v892_v3 = vpop.f32.mrb[12].mxu0 }
 0x294   : > { %v2425_v5 = vpop.f32.mrb[13].mxu0  ;;  %v906_v6 = vsel %vm899_vm1, %v892_v3, -inf }
 0x295   : > { %907 = vmax.xlane.f32.xlu1 %v906_v6  ;;  %v895_v7 = vpop.f32.mrb[14].mxu0  ;;  %v2570_v5 = vld [vmem:[%s3172_s17 + $0x38] sm:$0xff]  }
 0x296   : > { %v2426_v8 = vpop.f32.mrb[15].mxu0  ;;  %v909_v9 = vsel %vm899_vm1, %v895_v7, -inf }
 0x299   : > { %910 = vmax.xlane.f32.xlu1 %v909_v9 }
 0x31a   : > { %v902_v11 = vpop.xlane.xlu0 %901 }
 0x31b   : > { %v912_v12 = vsub.f32 %v851_v61, %v902_v11 }
 0x31d   : > { %v916_v13 = vmul.f32 1.442695, %v912_v12 }
 0x31e   : > { %v905_v14 = vpop.xlane.xlu0 %904 }
 0x31f   : > { %2651 = vpow2.f32 %v916_v13  ;;  %v913_v15 = vsub.f32 %v854_v0, %v905_v14  ;;  %v2566_v0 = vld [vmem:[%s3172_s17 + $0x18] sm:$0xff]  }
 0x321   : > { %v918_v16 = vmul.f32 1.442695, %v913_v15 }
 0x322   : > { %v908_v17 = vpop.xlane.xlu1 %907 }
 0x323   : > { %2653 = vpow2.f32 %v918_v16  ;;  %v914_v18 = vsub.f32 %v892_v3, %v908_v17  ;;  %v2569_v3 = vld [vmem:[%s3172_s17 + $0x30] sm:$0xff]  }
 0x324   : > { %v3301_v17 = vld [vmem:[%s3198_s18] sm:$0xff] }
 0x325   : > { %v920_v19 = vmul.f32 1.442695, %v914_v18  ;;  %v1055_v18 = vrot.slane %v3301_v17, %v3245_v24 }
 0x326   : > { %v911_v21 = vpop.xlane.xlu1 %910 }
 0x327   : > { %2655 = vpow2.f32 %v920_v19  ;;  %v915_v22 = vsub.f32 %v895_v7, %v911_v21  ;;  %v523_v21 = vunpack.c.l.bf16 %v3222_v10 }
 0x329   : > { %v2652_v27 = vpop.eup %2651  ;;  %v922_v28 = vmul.f32 1.442695, %v915_v22 }
 0x32a   : > { %v924_v29 = vsel %vm899_vm1, %v2652_v27, 0.0 }
 0x32b   : > { %2657 = vpow2.f32 %v922_v28  ;;  %925 = vadd.xlane.f32.xlu0 %v924_v29  ;;  %v524_v29 = vunpack.c.h.bf16 %v3222_v10 }
 0x32d   : > { %v2654_v30 = vpop.eup %2653 }
 0x32e   : > { %v927_v31 = vsel %vm899_vm1, %v2654_v30, 0.0 }
 0x32f   : > { %928 = vadd.xlane.f32.xlu1 %v927_v31 }
 0x331   : > { %v2656_v32 = vpop.eup %2655 }
 0x332   : > { %v930_v33 = vsel %vm899_vm1, %v2656_v32, 0.0 }
 0x333   : > { %931 = vadd.xlane.f32.xlu0 %v930_v33 }
 0x335   : > { %v2658_v34 = vpop.eup %2657 }
 0x336   : > { %v933_v35 = vsel %vm899_vm1, %v2658_v34, 0.0 }
 0x337   : > { %934 = vadd.xlane.f32.xlu1 %v933_v35 }
 0x3b8   : > { %v926_v49 = vpop.xlane.xlu0 %925 }
 0x3b9   : > { %2659 = vrcp.f32 %v926_v49 }
 0x3bc   : > { %v929_v50 = vpop.xlane.xlu1 %928 }
 0x3bd   : > { %2661 = vrcp.f32 %v929_v50 }
 0x3c0   : > { %v932_v51 = vpop.xlane.xlu0 %931 }
 0x3c1   : > { %2663 = vrcp.f32 %v932_v51 }
 0x3c3   : > { %v2660_v52 = vpop.eup %2659 }
 0x3c4   : > { %v935_v25 = vpop.xlane.xlu1 %934  ;;  %v940_v54 = vmul.f32 %v2660_v52, %v2652_v27 }
 0x3c5   : > { %2665 = vrcp.f32 %v935_v25 }
 0x3c7   : > { %v2662_v53 = vpop.eup %2661 }
 0x3c8   : > { %v941_v55 = vmul.f32 %v2662_v53, %v2654_v30 }
 0x3ca   : > { %v944_v56 = vpack.c.bf16 %v941_v55, %v940_v54 }
 0x3cb   : > { %v2664_v58 = vpop.eup %2663 }
 0x3cc   : > { %2430 = vmatmul.mubr.msk.bf16.vlgmr.msra.gmra.mrb[4].mxu1 %vm899_vm1, %v944_v56  ;;  %v942_v61 = vmul.f32 %v2664_v58, %v2656_v32 }
 0x3cd   : > { %2440 = vmatpush3.bf16.msra.mxu1 %v2563_v48 }
 0x3ce   : > { %2441 = vmatprep.subr.bf16.mxu1 %v2564_v57 }
 0x3cf   : > { %v2666_v60 = vpop.eup %2665 }
 0x3d0   : > { %v943_v62 = vmul.f32 %v2666_v60, %v2658_v34  ;;  %v525_v34 = vunpack.c.l.bf16 %v3236_v20 }
 0x3d1   : > { %2442 = vmatpush3.bf16.msra.mxu1 %v2564_v57 }
 0x3d2   : > { %v945_v63 = vpack.c.bf16 %v943_v62, %v942_v61  ;;  %2443 = vmatprep.subr.bf16.mxu1 %v2565_v59  ;;  %v2585_v62 = vld [vmem:[%s3179_s20 + $0x44] ss:$16 sps:$4 sm:$0xff]  }
 0x3d4   : > { %2436 = vmatmul.mubr.msk.bf16.vlgmr.msra.gmra.mrb[16].mxu0 %vm899_vm1, %v945_v63  ;;  %v2588_v63 = vld [vmem:[%s3179_s20 + $0x4c] ss:$16 sps:$4 sm:$0xff]  }
 0x3d5   : > { %2444 = vmatpush3.bf16.msra.mxu1 %v2565_v59  ;;  %1466 = vmatprep.mubr.bf16.mxu0 %v2886_v4 }
 0x3d6   : > { %2445 = vmatprep.subr.bf16.mxu1 %v2566_v0  ;;  %1435 = vmatpush1.bf16.msra.mxu0 %v2571_v40 }
 0x3d7   : > { %1436 = vmatprep.subr.bf16.mxu0 %v2579_v44  ;;  %v1205_v44 = vrot.slane %v3301_v17, %v3284_v36 }
 0x3d9   : > { %2446 = vmatpush3.bf16.msra.mxu1 %v2566_v0  ;;  %v2583_v0 = vld [vmem:[%s3179_s20 + $0x40] ss:$16 sps:$4 sm:$0xff]  }
 0x3da   : > { %2447 = vmatprep.subr.bf16.mxu1 %v2567_v1  ;;  %1437 = vmatpush1.bf16.msra.mxu0 %v2577_v46 }
 0x3db   : > { %1438 = vmatprep.subr.bf16.mxu0 %v2585_v62  ;;  %v2622_v62 = vld [vmem:[%s3185_s19 + $0x80] sm:$0xff]  }
 0x3dd   : > { %2448 = vmatpush3.bf16.msra.mxu1 %v2567_v1  ;;  %v2586_v1 = vld [vmem:[%s3179_s20 + $0x48] ss:$16 sps:$4 sm:$0xff]  }
 0x3de   : > { %2449 = vmatprep.subr.bf16.mxu1 %v2568_v2  ;;  %1439 = vmatpush1.bf16.msra.mxu0 %v2583_v0  ;;  %v2624_v0 = vld [vmem:[%s3185_s19 + $0xc8] sm:$0xff]  }
 0x3e1   : > { %2450 = vmatpush3.bf16.msra.mxu1 %v2568_v2  ;;  %v2591_v2 = vld [vmem:[%s3179_s20 + $0x64] ss:$16 sps:$4 sm:$0xff]  }
 0x3e2   : > { %2451 = vmatprep.subr.bf16.mxu1 %v2569_v3  ;;  %1440 = vmatprep.subr.bf16.mxu0 %v2591_v2  ;;  %v2626_v2 = vld [vmem:[%s3185_s19 + $0x88] sm:$0xff]  }
 0x3e5   : > { %2452 = vmatpush3.bf16.msra.mxu1 %v2569_v3  ;;  %v2594_v3 = vld [vmem:[%s3179_s20 + $0x6c] ss:$16 sps:$4 sm:$0xff]  }
 0x3e6   : > { %2453 = vmatprep.subr.bf16.mxu1 %v2570_v5 }
 0x3e9   : > { %2454 = vmatpush3.bf16.msra.mxu1 %v2570_v5  ;;  %v2589_v5 = vld [vmem:[%s3179_s20 + $0x60] ss:$16 sps:$4 sm:$0xff]  }
 0x3ea   : > { %1487 = vmatprep.subr.bf16.mxu1 %v2576_v43  ;;  %1441 = vmatpush1.bf16.msra.mxu0 %v2589_v5  ;;  %v2628_v5 = vld [vmem:[%s3185_s19 + $0xd0] sm:$0xff]  }
 0x49f   : > { %v983_v6 = vpop.f32.mrb[4].mxu1 }
 0x4a0   : > { %v2431_v7 = vpop.f32.mrb[5].mxu1 }
 0x4a1   : > { %v986_v8 = vpop.f32.mrb[6].mxu1  ;;  %v2597_v7 = vld [vmem:[%s3179_s20 + $0x84] ss:$16 sps:$4 sm:$0xff]  }
 0x4a2   : > { %v1034_v9 = vpack.c.bf16 %v986_v8, %v983_v6  ;;  %v2432_v11 = vpop.f32.mrb[7].mxu1  ;;  %v2592_v6 = vld [vmem:[%s3179_s20 + $0x68] ss:$16 sps:$4 sm:$0xff]   ;;  %v2600_v8 = vld [vmem:[%s3179_s20 + $0x8c] ss:$16 sps:$4 sm:$0xff]   ;;  %1442 = vmatprep.subr.bf16.mxu0 %v2597_v7 }
 0x4a3   : > { %v2598_v11 = vld [vmem:[%s3179_s20 + $0x88] ss:$16 sps:$4 sm:$0xff]  }
 0x4a4   : > { %2455 = vmatprep.mubr.bf16.mxu1 %v1034_v9  ;;  %v2595_v9 = vld [vmem:[%s3179_s20 + $0x80] ss:$16 sps:$4 sm:$0xff]  }
 0x4a5   : > { %1443 = vmatpush1.bf16.msra.mxu0 %v2595_v9  ;;  %v2631_v9 = vld [vmem:[%s3185_s19 + $0x58] sm:$0xff]  }
 0x4a7   : > { %v1027_v12 = vpop.f32.mrb[16].mxu0 }
 0x4a8   : > { %v2437_v13 = vpop.f32.mrb[17].mxu0 }
 0x4a9   : > { %v1030_v14 = vpop.f32.mrb[18].mxu0  ;;  %v2606_v13 = vld [vmem:[%s3179_s20 + $0xac] ss:$16 sps:$4 sm:$0xff]  }
 0x4aa   : > { %v1035_v15 = vpack.c.bf16 %v1030_v14, %v1027_v12  ;;  %v2438_v16 = vpop.f32.mrb[19].mxu0  ;;  %v2603_v12 = vld [vmem:[%s3179_s20 + $0xa4] ss:$16 sps:$4 sm:$0xff]   ;;  %v2601_v14 = vld [vmem:[%s3179_s20 + $0xa0] ss:$16 sps:$4 sm:$0xff]  }
 0x4ab   : > { %1444 = vmatprep.subr.bf16.mxu0 %v2603_v12  ;;  %v2609_v16 = vld [vmem:[%s3179_s20 + $0xc4] ss:$16 sps:$4 sm:$0xff]   ;;  %v2633_v12 = vld [vmem:[%s3185_s19 + $0x18] sm:$0xff]  }
 0x4ac   : > { %2456 = vmatmul.mubr.bf16.vlgmr.msra.gmra.mrb[8].mxu1 %v1035_v15  ;;  %v2604_v15 = vld [vmem:[%s3179_s20 + $0xa8] ss:$16 sps:$4 sm:$0xff]   ;;  %1445 = vmatpush1.bf16.msra.mxu0 %v2601_v14  ;;  %v2635_v14 = vld [vmem:[%s3185_s19 + $0x60] sm:$0xff]  }
 0x4ad   : > { %1519 = vmatprep.mubr.bf16.mxu1 %v2886_v4  ;;  %1488 = vmatpush1.bf16.msra.mxu1 %v2574_v42 }
 0x4ae   : > { %1489 = vmatprep.subr.bf16.mxu1 %v2582_v45  ;;  %1446 = vmatprep.subr.bf16.mxu0 %v2609_v16  ;;  %v1212_v45 = vsub.s32 3, %v3242_v23  ;;  %v2637_v16 = vld [vmem:[%s3185_s19 + $0x20] sm:$0xff]  }
 0x4b1   : > { %1490 = vmatpush1.bf16.msra.mxu1 %v2580_v47 }
 0x4b2   : > { %1491 = vmatprep.subr.bf16.mxu1 %v2588_v63  ;;  %v2623_v63 = vld [vmem:[%s3185_s19 + $0x48] sm:$0xff]  }
 0x4b5   : > { %1492 = vmatpush1.bf16.msra.mxu1 %v2586_v1 }
 0x4b6   : > { %1493 = vmatprep.subr.bf16.mxu1 %v2594_v3  ;;  %v2627_v3 = vld [vmem:[%s3185_s19 + $0x50] sm:$0xff]  }
 0x4b9   : > { %1494 = vmatpush1.bf16.msra.mxu1 %v2592_v6 }
 0x4ba   : > { %1495 = vmatprep.subr.bf16.mxu1 %v2600_v8  ;;  %v2630_v8 = vld [vmem:[%s3185_s19 + $0x90] sm:$0xff]  }
 0x4bd   : > { %1496 = vmatpush1.bf16.msra.mxu1 %v2598_v11  ;;  %v2632_v11 = vld [vmem:[%s3185_s19 + $0xd8] sm:$0xff]  }
 0x4be   : > { %1497 = vmatprep.subr.bf16.mxu1 %v2606_v13  ;;  %v2634_v13 = vld [vmem:[%s3185_s19 + $0x98] sm:$0xff]  }
 0x4c1   : > { %1498 = vmatpush1.bf16.msra.mxu1 %v2604_v15  ;;  %v2636_v15 = vld [vmem:[%s3185_s19 + $0xe0] sm:$0xff]  }
 0x57f   : > { %v2457_v19 = vpop.f32.mrb[8].mxu1 }
 0x580   : > { %v1138_v22 = vpop.f32.mrb[9].mxu1  ;;  %v1147_v31 = vadd.f32 %v2457_v19, %v1055_v18  ;;  %v2607_v19 = vld [vmem:[%s3179_s20 + $0xc0] ss:$16 sps:$4 sm:$0xff]  }
 0x581   : > { %v1139_v27 = vadd.f32 %v1138_v22, %v1055_v18  ;;  %v2458_v28 = vpop.f32.mrb[10].mxu1  ;;  %v2615_v22 = vld [vmem:[%s3179_s20 + $0xe4] ss:$16 sps:$4 sm:$0xff]   ;;  %1447 = vmatpush1.bf16.msra.mxu0 %v2607_v19  ;;  %v2639_v19 = vld [vmem:[%s3185_s19 + $0x68] sm:$0xff]  }
 0x582   : > { %v1141_v30 = vpop.f32.mrb[11].mxu1  ;;  %v1150_v35 = vadd.f32 %v2458_v28, %v1055_v18  ;;  %v1155_v39 = vadd.f32 %v1147_v31, %v525_v34  ;;  %v2616_v28 = vld [vmem:[%s3179_s20 + $0xe8] ss:$16 sps:$4 sm:$0xff]   ;;  %1448 = vmatprep.subr.bf16.mxu0 %v2615_v22  ;;  %v2620_v31 = vld [vmem:[%s3185_s19 + $0xc0] sm:$0xff]  }
 0x583   : > { %v1142_v32 = vadd.f32 %v1141_v30, %v1055_v18  ;;  %v1153_v33 = vadd.f32 %v1139_v27, %v523_v21  ;;  %v2612_v18 = vld [vmem:[%s3179_s20 + $0xcc] ss:$16 sps:$4 sm:$0xff]   ;;  %v2610_v21 = vld [vmem:[%s3179_s20 + $0xc8] ss:$16 sps:$4 sm:$0xff]   ;;  %v2613_v27 = vld [vmem:[%s3179_s20 + $0xe0] ss:$16 sps:$4 sm:$0xff]  }
 0x584   : > { %v1156_v10 = vadd.f32 %v1150_v35, %v526_v38  ;;  %1499 = vmatprep.subr.bf16.mxu1 %v2612_v18  ;;  %v2619_v30 = vld [vmem:[%s3185_s19 + $0x40] sm:$0xff]   ;;  %v2641_v22 = vld [vmem:[%s3185_s19 + $0x28] sm:$0xff]  }
 0x585   : > { %1157 = vadd.xlane.f32.xlu0 %v1153_v33  ;;  %v1154_v37 = vadd.f32 %v1142_v32, %v524_v29  ;;  %1500 = vmatpush1.bf16.msra.mxu1 %v2610_v21  ;;  %v2618_v29 = vld [vmem:[%s3179_s20 + $0xec] ss:$16 sps:$4 sm:$0xff]   ;;  %v2638_v18 = vld [vmem:[%s3185_s19 + $0xa0] sm:$0xff]   ;;  %s3479_s20 = sld [smem:[#allocation18_spill]] (!%p2285_p11) }
 0x586   : > { %1501 = vmatprep.subr.bf16.mxu1 %v2618_v29  ;;  %1449 = vmatpush1.bf16.msra.mxu0 %v2613_v27  ;;  %v2640_v21 = vld [vmem:[%s3185_s19 + $0xe8] sm:$0xff]   ;;  %v2644_v29 = vld [vmem:[%s3185_s19 + $0xf0] sm:$0xff]  }
 0x587   : > { %1159 = vadd.xlane.f32.xlu1 %v1154_v37  ;;  %2339 = vmatprep.subr.bf16.mxu0 %v2619_v30  ;;  %v2642_v27 = vld [vmem:[%s3185_s19 + $0xa8] sm:$0xff]   ;;  %v2645_v30 = vld [vmem:[%s3185_s19 + $0x30] sm:$0xff]  }
 0x589   : > { %1161 = vadd.xlane.f32.xlu0 %v1155_v39  ;;  %1502 = vmatpush1.bf16.msra.mxu1 %v2616_v28  ;;  %v2643_v28 = vld [vmem:[%s3185_s19 + $0x70] sm:$0xff]  }
 0x58a   : > { %2367 = vmatprep.subr.bf16.mxu1 %v2620_v31  ;;  %v2646_v31 = vld [vmem:[%s3185_s19 + $0xb0] sm:$0xff]  }
 0x58b   : > { %1163 = vadd.xlane.f32.xlu1 %v1156_v10 }
 0x612   : > { %v1158_v20 = vpop.xlane.xlu0 %1157 }
 0x613   : > { %v1166_v48 = vmul.f32 0.0078125, %v1158_v20 }
 0x614   : > { %v1160_v49 = vpop.xlane.xlu1 %1159 }
 0x615   : > { %v3317_v50 = vsub.f32 %v1153_v33, %v1166_v48  ;;  %v1167_v51 = vmul.f32 0.0078125, %v1160_v49 }
 0x616   : > { %v1162_v25 = vpop.xlane.xlu0 %1161 }
 0x617   : > { %v3319_v52 = vsub.f32 %v1154_v37, %v1167_v51  ;;  %v1168_v53 = vmul.f32 0.0078125, %v1162_v25  ;;  %v1174_v54 = vmul.f32 %v3317_v50, %v3317_v50  ;;  %v1213_v51 = vrot.slane %v3301_v17, %v1212_v45 }
 0x618   : > { %v1164_v55 = vpop.xlane.xlu1 %1163 }
 0x619   : > { %v3323_v56 = vsub.f32 %v1155_v39, %v1168_v53  ;;  %v1169_v57 = vmul.f32 0.0078125, %v1164_v55  ;;  %1178 = vadd.xlane.f32.xlu0 %v1174_v54  ;;  %v1175_v58 = vmul.f32 %v3319_v52, %v3319_v52 }
 0x61b   : > { %v3327_v59 = vsub.f32 %v1156_v10, %v1169_v57  ;;  %1180 = vadd.xlane.f32.xlu1 %v1175_v58  ;;  %v1176_v60 = vmul.f32 %v3323_v56, %v3323_v56 }
 0x61d   : > { %1182 = vadd.xlane.f32.xlu0 %v1176_v60  ;;  %v1177_v61 = vmul.f32 %v3327_v59, %v3327_v59 }
 0x61f   : > { %1184 = vadd.xlane.f32.xlu1 %v1177_v61  ;;  %v2621_v61 = vld [vmem:[%s3185_s19] sm:$0xff]  }
 0x6a6   : > { %v1179_v32 = vpop.xlane.xlu0 %1178 }
 0x6a7   : > { %v1186_v33 = vmul.f32 0.0078125, %v1179_v32  ;;  %v2647_v32 = vld [vmem:[%s3185_s19 + $0x78] sm:$0xff]  }
 0x6a8   : > { %v1181_v34 = vpop.xlane.xlu1 %1180 }
 0x6a9   : > { %v1190_v35 = vadd.f32 1e-05, %v1186_v33  ;;  %v1187_v37 = vmul.f32 0.0078125, %v1181_v34  ;;  %v2648_v33 = vld [vmem:[%s3185_s19 + $0xf8] sm:$0xff]  }
 0x6aa   : > { %v1183_v38 = vpop.xlane.xlu0 %1182  ;;  %v2649_v34 = vld [vmem:[%s3185_s19 + $0x38] sm:$0xff]  }
 0x6ab   : > { %2667 = vrsqrt.f32 %v1190_v35  ;;  %v1191_v39 = vadd.f32 1e-05, %v1187_v37  ;;  %v1188_v10 = vmul.f32 0.0078125, %v1183_v38  ;;  %v2650_v35 = vld [vmem:[%s3185_s19 + $0xb8] sm:$0xff]   ;;  %v1252_v37 = vld [vmem:[%s3205_s10] sm:$0xf] }
 0x6ac   : > { %v1185_v40 = vpop.xlane.xlu1 %1184  ;;  %v1257_v38 = vrot.slane %v1252_v37, %v3245_v24 }
 0x6ad   : > { %2669 = vrsqrt.f32 %v1191_v39  ;;  %v1192_v41 = vadd.f32 1e-05, %v1188_v10  ;;  %v1189_v42 = vmul.f32 0.0078125, %v1185_v40  ;;  %v1265_v39 = vrot.slane %v1252_v37, %v3284_v36 }
 0x6ae   : > { %v1261_v10 = vrot.slane %v1252_v37, %v3251_v26  ;;  %v1269_v40 = vrot.slane %v1252_v37, %v1212_v45 }
 0x6af   : > { %2671 = vrsqrt.f32 %v1192_v41  ;;  %v1193_v43 = vadd.f32 1e-05, %v1189_v42 }
 0x6b1   : > { %2673 = vrsqrt.f32 %v1193_v43 }
 0x6b5   : > { %v2668_v46 = vpop.eup %2667 }
 0x6b6   : > { %v1198_v47 = vmul.f32 %v2668_v46, %v3317_v50 }
 0x6b7   : > { %v2670_v20 = vpop.eup %2669 }
 0x6b8   : > { %v1199_v48 = vmul.f32 %v2670_v20, %v3319_v52  ;;  %v1206_v49 = vmul.f32 %v1205_v44, %v1198_v47 }
 0x6b9   : > { %v2672_v25 = vpop.eup %2671 }
 0x6ba   : > { %v1207_v53 = vmul.f32 %v1205_v44, %v1199_v48  ;;  %v3367_v55 = vadd.f32 %v1213_v51, %v1206_v49  ;;  %v1200_v58 = vmul.f32 %v2672_v25, %v3323_v56 }
 0x6bb   : > { %v2674_v54 = vpop.eup %2673 }
 0x6bc   : > { %v3369_v57 = vadd.f32 %v1213_v51, %v1207_v53  ;;  %v1201_v50 = vmul.f32 %v2674_v54, %v3327_v59  ;;  %v1208_v1 = vmul.f32 %v1205_v44, %v1200_v58  ;;  %v2625_v59 = vld [vmem:[%s3185_s19 + $0x8] sm:$0xff]  }
 0x6be   : > { %v1218_v52 = vpack.c.bf16 %v3369_v57, %v3367_v55  ;;  %v1209_v60 = vmul.f32 %v1205_v44, %v1201_v50  ;;  %v3387_v6 = vadd.f32 %v1213_v51, %v1208_v1 }
 0x6c0   : > { %1467 = vmatmul.mubr.bf16.vlgmr.msra.gmra.mrb[20].mxu0 %v1218_v52  ;;  %1520 = vmatmul.mubr.bf16.vlgmr.msra.gmra.mrb[12].mxu1 %v1218_v52  ;;  %v3381_v56 = vadd.f32 %v1213_v51, %v1209_v60 }
 0x6c1   : > { %1476 = vmatprep.mubr.bf16.mxu0 %v2886_v4  ;;  %1529 = vmatprep.mubr.bf16.mxu1 %v2886_v4  ;;  %v2629_v4 = vld [vmem:[%s3185_s19 + $0x10] sm:$0xff]  }
 0x6c2   : > { %2340 = vmatpush3.bf16.msra.mxu0 %v2621_v61  ;;  %2368 = vmatpush3.bf16.msra.mxu1 %v2622_v62  ;;  %v1219_v7 = vpack.c.bf16 %v3381_v56, %v3387_v6 }
 0x6c3   : > { %2341 = vmatprep.subr.bf16.mxu0 %v2623_v63  ;;  %2369 = vmatprep.subr.bf16.mxu1 %v2624_v0 }
 0x6c6   : > { %2342 = vmatpush3.bf16.msra.mxu0 %v2625_v59  ;;  %2370 = vmatpush3.bf16.msra.mxu1 %v2626_v2 }
 0x6c7   : > { %2343 = vmatprep.subr.bf16.mxu0 %v2627_v3  ;;  %2371 = vmatprep.subr.bf16.mxu1 %v2628_v5 }
 0x6c8   : > { %1477 = vmatmul.mubr.bf16.gmra.mrb[24].mxu0 %v1219_v7  ;;  %1530 = vmatmul.mubr.bf16.gmra.mrb[16].mxu1 %v1219_v7 }
 0x6ca   : > { %2344 = vmatpush3.bf16.msra.mxu0 %v2629_v4  ;;  %2372 = vmatpush3.bf16.msra.mxu1 %v2630_v8 }
 0x6cb   : > { %2345 = vmatprep.subr.bf16.mxu0 %v2631_v9  ;;  %2373 = vmatprep.subr.bf16.mxu1 %v2632_v11 }
 0x6ce   : > { %2346 = vmatpush3.bf16.msra.mxu0 %v2633_v12  ;;  %2374 = vmatpush3.bf16.msra.mxu1 %v2634_v13 }
 0x6cf   : > { %2347 = vmatprep.subr.bf16.mxu0 %v2635_v14  ;;  %2375 = vmatprep.subr.bf16.mxu1 %v2636_v15 }
 0x6d2   : > { %2348 = vmatpush3.bf16.msra.mxu0 %v2637_v16  ;;  %2376 = vmatpush3.bf16.msra.mxu1 %v2638_v18 }
 0x6d3   : > { %2349 = vmatprep.subr.bf16.mxu0 %v2639_v19  ;;  %2377 = vmatprep.subr.bf16.mxu1 %v2640_v21 }
 0x6d6   : > { %2350 = vmatpush3.bf16.msra.mxu0 %v2641_v22  ;;  %2378 = vmatpush3.bf16.msra.mxu1 %v2642_v27 }
 0x6d7   : > { %2351 = vmatprep.subr.bf16.mxu0 %v2643_v28  ;;  %2379 = vmatprep.subr.bf16.mxu1 %v2644_v29 }
 0x6da   : > { %2352 = vmatpush3.bf16.msra.mxu0 %v2645_v30  ;;  %2380 = vmatpush3.bf16.msra.mxu1 %v2646_v31 }
 0x6db   : > { %2353 = vmatprep.subr.bf16.mxu0 %v2647_v32  ;;  %2381 = vmatprep.subr.bf16.mxu1 %v2648_v33 }
 0x6de   : > { %2354 = vmatpush3.bf16.msra.mxu0 %v2649_v34  ;;  %2382 = vmatpush3.bf16.msra.mxu1 %v2650_v35 }
 0x793   : > { %v1468_v41 = vpop.f32.mrb[20].mxu0  ;;  %v1521_v42 = vpop.f32.mrb[12].mxu1 }
 0x794   : > { %v1469_v43 = vadd.f32 %v1468_v41, %v1257_v38  ;;  %v1522_v44 = vadd.f32 %v1521_v42, %v1265_v39  ;;  %v1470_v46 = vpop.f32.mrb[21].mxu0  ;;  %v1523_v47 = vpop.f32.mrb[13].mxu1 }
 0x795   : > { %v1471_v20 = vadd.f32 %v1470_v46, %v1261_v10  ;;  %v1524_v48 = vadd.f32 %v1523_v47, %v1269_v40  ;;  %v1472_v49 = vpop.f32.mrb[22].mxu0  ;;  %v1525_v51 = vpop.f32.mrb[14].mxu1 }
 0x796   : > { %v1473_v25 = vadd.f32 %v1472_v49, %v1257_v38  ;;  %v1526_v53 = vadd.f32 %v1525_v51, %v1265_v39  ;;  %v1474_v24 = vpop.f32.mrb[23].mxu0  ;;  %v1527_v54 = vpop.f32.mrb[15].mxu1  ;;  %v1540_v50 = vmax.f32 %v1469_v43, 0.0  ;;  %v1542_v52 = vmax.f32 %v1522_v44, 0.0 }
 0x797   : > { %v1475_v36 = vadd.f32 %v1474_v24, %v1261_v10  ;;  %v1528_v58 = vadd.f32 %v1527_v54, %v1269_v40  ;;  %v1541_v61 = vmax.f32 %v1471_v20, 0.0  ;;  %v1543_v62 = vmax.f32 %v1524_v48, 0.0 }
 0x798   : > { %v1544_v60 = vmax.f32 %v1473_v25, 0.0  ;;  %v1546_v45 = vmax.f32 %v1526_v53, 0.0 }
 0x799   : > { %v1545_v63 = vmax.f32 %v1475_v36, 0.0  ;;  %v1547_v0 = vmax.f32 %v1528_v58, 0.0 }
 0x79a   : > { %v1556_v1 = vpack.c.bf16 %v1544_v60, %v1540_v50  ;;  %v1558_v59 = vpack.c.bf16 %v1546_v45, %v1542_v52 }
 0x79b   : > { %v1557_v2 = vpack.c.bf16 %v1545_v63, %v1541_v61  ;;  %v1559_v3 = vpack.c.bf16 %v1547_v0, %v1543_v62  ;;  %v1478_v5 = vpop.f32.mrb[24].mxu0  ;;  %v1531_v7 = vpop.f32.mrb[16].mxu1 }
 0x79c   : > { %v1479_v4 = vadd.f32 %v1478_v5, %v1257_v38  ;;  %v1532_v8 = vadd.f32 %v1531_v7, %v1265_v39  ;;  %v1480_v9 = vpop.f32.mrb[25].mxu0  ;;  %v1533_v11 = vpop.f32.mrb[17].mxu1 }
 0x79d   : > { %v1481_v12 = vadd.f32 %v1480_v9, %v1261_v10  ;;  %v1534_v13 = vadd.f32 %v1533_v11, %v1269_v40  ;;  %v1482_v14 = vpop.f32.mrb[26].mxu0  ;;  %v1535_v15 = vpop.f32.mrb[18].mxu1  ;;  %1856 = vmatprep.mubr.bf16.mxu0 %v1557_v2  ;;  %1905 = vmatprep.mubr.bf16.mxu1 %v1559_v3 }
 0x79e   : > { %v1483_v16 = vadd.f32 %v1482_v14, %v1257_v38  ;;  %v1536_v18 = vadd.f32 %v1535_v15, %v1265_v39  ;;  %v1484_v19 = vpop.f32.mrb[27].mxu0  ;;  %v1537_v21 = vpop.f32.mrb[19].mxu1  ;;  %1857 = vmatmul.mubr.bf16.vlgmr.msra.gmra.mrb[28].mxu0 %v1556_v1  ;;  %1906 = vmatmul.mubr.bf16.vlgmr.msra.gmra.mrb[20].mxu1 %v1558_v59  ;;  %v1548_v28 = vmax.f32 %v1479_v4, 0.0  ;;  %v1550_v29 = vmax.f32 %v1532_v8, 0.0 }
 0x79f   : > { %v1485_v22 = vadd.f32 %v1484_v19, %v1261_v10  ;;  %v1538_v27 = vadd.f32 %v1537_v21, %v1269_v40  ;;  %v1549_v32 = vmax.f32 %v1481_v12, 0.0  ;;  %v1551_v33 = vmax.f32 %v1534_v13, 0.0 }
 0x7a0   : > { %v1552_v30 = vmax.f32 %v1483_v16, 0.0  ;;  %v1554_v31 = vmax.f32 %v1536_v18, 0.0  ;;  %v1631_v10 = vrot.slane %v3301_v17, %v3251_v26 }
 0x7a1   : > { %v1553_v34 = vmax.f32 %v1485_v22, 0.0  ;;  %v1555_v35 = vmax.f32 %v1538_v27, 0.0 }
 0x7a2   : > { %v1560_v37 = vpack.c.bf16 %v1552_v30, %v1548_v28  ;;  %v1562_v41 = vpack.c.bf16 %v1554_v31, %v1550_v29 }
 0x7a3   : > { %v1561_v42 = vpack.c.bf16 %v1553_v34, %v1549_v32  ;;  %v1563_v43 = vpack.c.bf16 %v1555_v35, %v1551_v33 }
 0x7a5   : > { %1864 = vmatprep.mubr.bf16.mxu0 %v1561_v42  ;;  %1913 = vmatprep.mubr.bf16.mxu1 %v1563_v43  ;;  %v1972_v43 = vsub.s32 4, %v3242_v23 }
 0x7a6   : > { %1865 = vmatmul.mubr.bf16.gmra.mrb[32].mxu0 %v1560_v37  ;;  %1914 = vmatmul.mubr.bf16.gmra.mrb[24].mxu1 %v1562_v41 }
 0x871   : > { %v2355_v38 = vpop.f32.mrb[28].mxu0  ;;  %v2383_v39 = vpop.f32.mrb[20].mxu1 }
 0x872   : > { %v2356_v40 = vpop.f32.mrb[29].mxu0  ;;  %v2384_v44 = vpop.f32.mrb[21].mxu1 }
 0x873   : > { %v2357_v46 = vadd.f32 %v2356_v40, %v2355_v38  ;;  %v2385_v47 = vadd.f32 %v2384_v44, %v2383_v39  ;;  %v2358_v20 = vpop.f32.mrb[30].mxu0  ;;  %v2386_v48 = vpop.f32.mrb[22].mxu1  ;;  %v1973_v44 = vrot.slane %v3301_v17, %v1972_v43 }
 0x874   : > { %v2359_v49 = vpop.f32.mrb[31].mxu0  ;;  %v2387_v51 = vpop.f32.mrb[23].mxu1 }
 0x875   : > { %v1859_v25 = vadd.f32 %v2357_v46, %v1631_v10  ;;  %v2360_v53 = vadd.f32 %v2359_v49, %v2358_v20  ;;  %v2388_v24 = vadd.f32 %v2387_v51, %v2386_v48  ;;  %v1980_v46 = vsub.s32 5, %v3242_v23 }
 0x877   : > { %v1908_v54 = vadd.f32 %v2385_v47, %v1859_v25  ;;  %v1862_v36 = vadd.f32 %v2360_v53, %v1631_v10  ;;  %v1981_v49 = vrot.slane %v3301_v17, %v1980_v46 }
 0x879   : > { %v1911_v58 = vadd.f32 %v2388_v24, %v1862_v36  ;;  %v2361_v50 = vpop.f32.mrb[32].mxu0  ;;  %v2389_v52 = vpop.f32.mrb[24].mxu1  ;;  %v1922_v60 = vadd.f32 %v1908_v54, %v3367_v55 }
 0x87a   : > { %v2362_v45 = vpop.f32.mrb[33].mxu0  ;;  %v2390_v26 = vpop.f32.mrb[25].mxu1 }
 0x87b   : > { %v2363_v61 = vadd.f32 %v2362_v45, %v2361_v50  ;;  %v2391_v62 = vadd.f32 %v2390_v26, %v2389_v52  ;;  %v2392_v63 = vpop.f32.mrb[26].mxu1  ;;  %1926 = vadd.xlane.f32.xlu0 %v1922_v60  ;;  %v2364_v0 = vpop.f32.mrb[34].mxu0  ;;  %v1923_v1 = vadd.f32 %v1911_v58, %v3369_v57 }
 0x87c   : > { %v2365_v59 = vpop.f32.mrb[35].mxu0  ;;  %v2393_v2 = vpop.f32.mrb[27].mxu1 }
 0x87d   : > { %v1867_v3 = vadd.f32 %v2363_v61, %v1631_v10  ;;  %v2366_v5 = vadd.f32 %v2365_v59, %v2364_v0  ;;  %v2394_v7 = vadd.f32 %v2393_v2, %v2392_v63  ;;  %1928 = vadd.xlane.f32.xlu1 %v1923_v1 }
 0x87f   : > { %v1916_v4 = vadd.f32 %v2391_v62, %v1867_v3  ;;  %v1870_v8 = vadd.f32 %v2366_v5, %v1631_v10 }
 0x881   : > { %v1919_v9 = vadd.f32 %v2394_v7, %v1870_v8  ;;  %v1924_v55 = vadd.f32 %v1916_v4, %v3387_v6 }
 0x883   : > { %1930 = vadd.xlane.f32.xlu0 %v1924_v55  ;;  %v1925_v11 = vadd.f32 %v1919_v9, %v3381_v56 }
 0x885   : > { %1932 = vadd.xlane.f32.xlu1 %v1925_v11 }
 0x908   : > { %v1927_v12 = vpop.xlane.xlu0 %1926 }
 0x909   : > { %v1934_v13 = vmul.f32 0.0078125, %v1927_v12 }
 0x90a   : > { %v1929_v14 = vpop.xlane.xlu1 %1928 }
 0x90b   : > { %v1938_v15 = vsub.f32 %v1922_v60, %v1934_v13  ;;  %v1935_v57 = vmul.f32 0.0078125, %v1929_v14 }
 0x90d   : > { %v1939_v16 = vsub.f32 %v1923_v1, %v1935_v57  ;;  %v1942_v18 = vmul.f32 %v1938_v15, %v1938_v15 }
 0x90f   : > { %1946 = vadd.xlane.f32.xlu0 %v1942_v18  ;;  %v1943_v19 = vmul.f32 %v1939_v16, %v1939_v16 }
 0x910   : > { %v1931_v21 = vpop.xlane.xlu0 %1930 }
 0x911   : > { %v1936_v22 = vmul.f32 0.0078125, %v1931_v21  ;;  %1948 = vadd.xlane.f32.xlu1 %v1943_v19 }
 0x912   : > { %v1933_v27 = vpop.xlane.xlu1 %1932 }
 0x913   : > { %v1940_v28 = vsub.f32 %v1924_v55, %v1936_v22  ;;  %v1937_v29 = vmul.f32 0.0078125, %v1933_v27 }
 0x915   : > { %v1941_v6 = vsub.f32 %v1925_v11, %v1937_v29  ;;  %v1944_v30 = vmul.f32 %v1940_v28, %v1940_v28 }
 0x917   : > { %1950 = vadd.xlane.f32.xlu0 %v1944_v30  ;;  %v1945_v56 = vmul.f32 %v1941_v6, %v1941_v6 }
 0x919   : > { %1952 = vadd.xlane.f32.xlu1 %v1945_v56 }
 0x99c   : > { %v1947_v31 = vpop.xlane.xlu0 %1946 }
 0x99d   : > { %v1954_v32 = vmul.f32 0.0078125, %v1947_v31 }
 0x99e   : > { %v1949_v33 = vpop.xlane.xlu1 %1948 }
 0x99f   : > { %v1958_v34 = vadd.f32 1e-05, %v1954_v32  ;;  %v1955_v35 = vmul.f32 0.0078125, %v1949_v33 }
 0x9a1   : > { %2675 = vrsqrt.f32 %v1958_v34  ;;  %v1959_v37 = vadd.f32 1e-05, %v1955_v35 }
 0x9a3   : > { %2677 = vrsqrt.f32 %v1959_v37 }
 0x9a4   : > { %v1951_v41 = vpop.xlane.xlu0 %1950 }
 0x9a5   : > { %v1956_v42 = vmul.f32 0.0078125, %v1951_v41 }
 0x9a6   : > { %v1953_v38 = vpop.xlane.xlu1 %1952 }
 0x9a7   : > { %v1960_v39 = vadd.f32 1e-05, %v1956_v42  ;;  %v1957_v10 = vmul.f32 0.0078125, %v1953_v38 }
 0x9a9   : > { %2679 = vrsqrt.f32 %v1960_v39  ;;  %v1961_v40 = vadd.f32 1e-05, %v1957_v10 }
 0x9ab   : > { %v2676_v47 = vpop.eup %2675  ;;  %2681 = vrsqrt.f32 %v1961_v40 }
 0x9ac   : > { %v1966_v20 = vmul.f32 %v2676_v47, %v1938_v15 }
 0x9ad   : > { %v2678_v48 = vpop.eup %2677 }
 0x9ae   : > { %v1974_v51 = vmul.f32 %v1973_v44, %v1966_v20  ;;  %v1967_v25 = vmul.f32 %v2678_v48, %v1939_v16 }
 0x9b0   : > { %v1975_v53 = vmul.f32 %v1973_v44, %v1967_v25  ;;  %v1982_v24 = vadd.f32 %v1981_v49, %v1974_v51 }
 0x9b2   : > { %v1983_v54 = vadd.f32 %v1981_v49, %v1975_v53 }
 0x9b3   : > { %v2680_v36 = vpop.eup %2679 }
 0x9b4   : > { %v1986_v58 = vpack.c.bf16 %v1983_v54, %v1982_v24  ;;  %v1968_v50 = vmul.f32 %v2680_v36, %v1940_v28 }
 0x9b5   : > { %v2682_v52 = vpop.eup %2681 }
 0x9b6   : > { %1988 = vst [vmem:[#allocation2] sm:$0xff] %v1986_v58  ;;  %v1976_v60 = vmul.f32 %v1973_v44, %v1968_v50  ;;  %v1969_v45 = vmul.f32 %v2682_v52, %v1941_v6  ;;  %2304 = vst [vmem:[%s3479_s20] sm:$0xff] (!%p2285_p11), %v1986_v58  }
 0x9b8   : > { %v1977_v26 = vmul.f32 %v1973_v44, %v1969_v45  ;;  %v1984_v23 = vadd.f32 %v1981_v49, %v1976_v60  ;;  %1993 = sbr.rel (%p2285_p11) target bundleno = 2495 (0x9bf), region = 80 }
 0x9ba   : > { %v1985_v61 = vadd.f32 %v1981_v49, %v1977_v26 }
 0x9bc   : > { %v1987_v62 = vpack.c.bf16 %v1985_v61, %v1984_v23 }
 0x9be   : > { %1989 = vst [vmem:[#allocation2 + $0x8] sm:$0xff] %v1987_v62  ;;  %2310 = vst [vmem:[%s3479_s20 + $0x8] sm:$0xff] (!%p2285_p11), %v1987_v62  }
 0x9bf PF: > { %s3480_s30 = sld [smem:[#allocation15_spill]]  ;;  %s3481_s21 = sld [smem:[#allocation14_spill]] }
 0x9c0   : > { %s3482_s29 = sld [smem:[#allocation16_spill]]  ;;  %s3483_s27 = smov %s2867_s28 }
 0x9c5   : > { %p24_p13 = scmp.ge.s32.totalorder %s3480_s30, 4   ;;  %s3484_s28 = smov %s3481_s21 }
 0x9c7   :  { %26 = sbr.rel (!%p24_p13) target bundleno = 10 (0xa), region = 150 }
 0x9ce   :  { %2023 = vsyncpa [#allocation4], 1 }
 0x9cf   :  { %2025 = vsyncpa [#allocation4 + $0x1], 1 }
 0x9d0   :  { %2026 = vsyncpa [#allocation6], 1 }
 0x9d1   :  { %2028 = vsyncpa [#allocation6 + $0x1], 1 }
 0x9d2   :  { %2029 = vsyncpa [#allocation9], 1 }
 0x9d3   :  { %2031 = vsyncpa [#allocation9 + $0x1], 1 }

</bundles_post_ra>
